<compile_context>
chip_gen: v7x
topology: tpu7x:2x2x1
jax: 0.10.0
libtpu: 0.0.40
codegen_flags: <defaults>
</compile_context>

<pallas_src>
import random

import jax
import jax.numpy as jnp
from jax.experimental import pallas as pl

B_PAD_MIN = 8      # sublane padding for the batch dimension
V_PAD = 128        # lane padding for the output vocabulary


# ----------------------------------------------------------------------------
# Encoder LSTM: whole source sequence in one kernel, time loop unrolled.
# Input projection (x @ W_ih + b) is precomputed in the wrapper; per step only
# h @ W_hh + gate math runs here.
# ----------------------------------------------------------------------------
def make_enc_kernel(S, H):
    def enc_kernel(xw_ref, whh_ref, out_ref, cf_ref):
        B = xw_ref.shape[1]
        h = jnp.zeros((B, H), jnp.float32)
        c = jnp.zeros((B, H), jnp.float32)
        for t in range(S):
            if t == 0:
                gates = xw_ref[0]                       # h == 0 -> skip the matmul
            else:
                gates = xw_ref[t] + jnp.dot(h.astype(jnp.bfloat16), whh_ref[...],
                                            preferred_element_type=jnp.float32)
            i_g = jax.nn.sigmoid(gates[:, 0 * H:1 * H])
            f_g = jax.nn.sigmoid(gates[:, 1 * H:2 * H])
            g_g = jnp.tanh(gates[:, 2 * H:3 * H])
            o_g = jax.nn.sigmoid(gates[:, 3 * H:4 * H])
            c = f_g * c + i_g * g_g
            h = o_g * jnp.tanh(c)
            out_ref[t] = h                              # time-major encoder outputs
        cf_ref[...] = c                                 # final cell state
    return enc_kernel


def encoder_lstm(xw, whh_bf16):
    S, B, G = xw.shape
    H = G // 4
    return pl.pallas_call(
        make_enc_kernel(S, H),
        out_shape=(jax.ShapeDtypeStruct((S, B, H), jnp.float32),   # enc outputs (time-major)
                   jax.ShapeDtypeStruct((B, H), jnp.float32)),     # final c
    )(xw, whh_bf16)


# ----------------------------------------------------------------------------
# Fused decoder: whole target loop in one kernel, time loop unrolled, teacher
# forcing flags baked statically.  Per step: attention + fused LSTM cell +
# fused (fc | next-step attention query) matmul + next-input selection.
# ----------------------------------------------------------------------------
def make_dec_kernel(tf_flags, V_pad):
    Tm1 = len(tf_flags)

    def dec_kernel(h0_ref, c0_ref, eh0_ref, enc_ref, ee_ref, v_ref,
                   wl_ref, bl_ref, wo_ref, bo_ref, emb_tbl_ref, tgt_emb_ref,
                   logits_ref):
        B, H = h0_ref.shape
        enc = enc_ref[...]                              # (S, B, H) f32
        ee = ee_ref[...]                                # (S, B, H) hoisted enc@W_ae + b
        v = v_ref[...]                                  # (1, H)
        bl = bl_ref[...]                                # (1, 4H)
        bo = bo_ref[...]                                # (1, V_pad + H)

        h = h0_ref[...]                                 # (B, H)
        c = c0_ref[...]                                 # (B, H)
        e_h = eh0_ref[...]                              # (B, H) = h0 @ W_ah (seeded in wrapper)
        emb = tgt_emb_ref[0]                            # (B, E) embedding of tgt[:, 0]

        for j in range(Tm1):
            # --- attention (key projection hoisted; query projection carried in e_h) ---
            energy = jnp.tanh(ee + e_h[None, :, :])                       # (S, B, H)
            scores = jnp.sum(v[None, :, :] * energy, axis=2)              # (S, B)
            scores = scores - jnp.max(scores, axis=0, keepdims=True)
            expw = jnp.exp(scores)
            attn = expw * pl.reciprocal(jnp.sum(expw, axis=0, keepdims=True),
                                        approx=True)                      # softmax over S
            context = jnp.sum(attn[:, :, None] * enc, axis=0)             # (B, H)

            # --- fused LSTM gates: [emb | context | h] @ [W_ih_x; W_ih_c; W_hh] ---
            x_cat = jnp.concatenate([emb, context, h], axis=1).astype(jnp.bfloat16)
            gates = jnp.dot(x_cat, wl_ref[...],
                            preferred_element_type=jnp.float32) + bl      # (B, 4H)
            i_g = jax.nn.sigmoid(gates[:, 0 * H:1 * H])
            f_g = jax.nn.sigmoid(gates[:, 1 * H:2 * H])
            g_g = jnp.tanh(gates[:, 2 * H:3 * H])
            o_g = jax.nn.sigmoid(gates[:, 3 * H:4 * H])
            c = f_g * c + i_g * g_g
            h = o_g * jnp.tanh(c)

            # --- fused fc + next-step attention query projection ---
            out = jnp.dot(h.astype(jnp.bfloat16), wo_ref[...],
                          preferred_element_type=jnp.float32) + bo        # (B, V_pad + H)
            logits = out[:, :V_pad]
            e_h = out[:, V_pad:]
            logits_ref[j] = logits

            # --- next decoder input (not needed after the last step) ---
            if j + 1 < Tm1:
                if tf_flags[j]:
                    emb = tgt_emb_ref[j + 1]            # teacher forcing: precomputed embedding
                else:
                    col = jax.lax.broadcasted_iota(jnp.int32, (B, V_pad), 1)
                    mx = jnp.max(logits, axis=1, keepdims=True)
                    # first (lowest-index) maximum -> matches torch.argmax tie-breaking;
                    # padded vocab columns carry a -1e30 bias so they are never picked.
                    top1 = jnp.min(jnp.where(logits >= mx, col, jnp.int32(V_pad)),
                                   axis=1, keepdims=True)                 # (B, 1)
                    onehot = (col == top1).astype(jnp.bfloat16)           # (B, V_pad)
                    emb = jnp.dot(onehot, emb_tbl_ref[...],
                                  preferred_element_type=jnp.float32)     # (B, E)
    return dec_kernel


def decoder_loop(tf_flags, h0, c0, eh0, enc_out, ee, tgt_emb, p):
    S, B, H = enc_out.shape
    T = tgt_emb.shape[0]
    V_pad = p["fc_attn_w"].shape[1] - H
    return pl.pallas_call(
        make_dec_kernel(tuple(tf_flags), V_pad),
        out_shape=jax.ShapeDtypeStruct((T - 1, B, V_pad), jnp.float32),
    )(h0, c0, eh0, enc_out, ee,
      p["attn_v"], p["dec_w_fused"], p["dec_b"],
      p["fc_attn_w"], p["fc_attn_b"], p["dec_emb"], tgt_emb)


# ----------------------------------------------------------------------------
# Full Seq2Seq forward.  Wrapper does embedding lookups, padding and the
# step-invariant hoisted matmuls; all recurrent work runs in the two kernels.
# ----------------------------------------------------------------------------
def seq2seq_forward(p, src, tgt, teacher_forcing_ratio=0.8):
    random.seed(0)                                     # deterministic teacher forcing pattern
    B, S = src.shape
    _, T = tgt.shape
    H = p["attn_wh_t"].shape[0]
    E = p["enc_emb"].shape[1]
    V_out = p["vocab_out"]
    B_pad = max(B_PAD_MIN, -(-B // 8) * 8)
    bf16 = jnp.bfloat16

    # host-side coin flips, baked statically into the decoder kernel
    tf_flags = [1 if random.random() < teacher_forcing_ratio else 0 for _ in range(1, T)]

    # --- encoder prep: embedding lookup, batch pad, hoisted X @ W_ih + b (bf16 MXU) ---
    emb_src = p["enc_emb"][src]                                   # (B, S, E), dropout = identity
    emb_src = jnp.pad(emb_src, ((0, B_pad - B), (0, 0), (0, 0)))
    x_tbe = jnp.transpose(emb_src, (1, 0, 2))                     # (S, B_pad, E) time-major
    xw = (jnp.dot(x_tbe.reshape(S * B_pad, E).astype(bf16), p["enc_wih_t"],
                  preferred_element_type=jnp.float32)
          + p["enc_b"]).reshape(S, B_pad, 4 * H)

    enc_out, c0 = encoder_lstm(xw, p["enc_whh_t"])                # (S,B_pad,H), (B_pad,H)
    h0 = enc_out[-1]                                              # final hidden = last output

    # --- decoder prep: hoisted attention key projection, step-0 query projection,
    #     precomputed teacher-forced input embeddings ---
    ee = (jnp.dot(enc_out.reshape(S * B_pad, H).astype(bf16), p["attn_we_t"],
                  preferred_element_type=jnp.float32)
          + p["attn_b"]).reshape(S, B_pad, H)
    eh0 = jnp.dot(h0.astype(bf16), p["attn_wh_t"], preferred_element_type=jnp.float32)

    tgt_p = jnp.zeros((B_pad, T), tgt.dtype).at[:B].set(tgt)
    tgt_emb = jnp.transpose(p["dec_emb"][tgt_p], (1, 0, 2)).astype(jnp.float32)  # (T, B_pad, E)

    logits_all = decoder_loop(tf_flags, h0, c0, eh0, enc_out, ee, tgt_emb, p)

    outputs = jnp.zeros((B, T, V_out), jnp.float32)               # position 0 stays zero (as in torch)
    outputs = outputs.at[:, 1:, :].set(
        jnp.transpose(logits_all[:, :B, :V_out], (1, 0, 2)))
    return outputs


# ----------------------------------------------------------------------------
# Deterministic parameter construction (bf16 weight matrices, f32 biases)
# ----------------------------------------------------------------------------
def make_params(key, V_in, V_out, E, H, v_pad=V_PAD):
    ks = iter(jax.random.split(key, 24))

    def uni(shape, scale):
        return jax.random.uniform(next(ks), shape, jnp.float32, -scale, scale)

    s = 1.0 / (H ** 0.5)
    bf16 = jnp.bfloat16

    enc_emb = jax.random.normal(next(ks), (V_in, E), jnp.float32).at[0].set(0.0)   # padding_idx=0
    dec_emb = jax.random.normal(next(ks), (V_out, E), jnp.float32).at[0].set(0.0)  # padding_idx=0
    dec_emb = jnp.zeros((v_pad, E), jnp.float32).at[:V_out].set(dec_emb)

    attn_wh_t = uni((H, H), s)              # attn.weight[:, :H]^T  (query / hidden part)
    attn_we_t = uni((H, H), s)              # attn.weight[:, H:]^T  (key / encoder part)

    # decoder LSTM: stacked fused weight  [W_ih (embedded cols); W_ih (context cols); W_hh]
    dec_w_fused = jnp.concatenate(
        [uni((E, 4 * H), s), uni((H, 4 * H), s), uni((H, 4 * H), s)], axis=0)  # (E+2H, 4H)

    # fused (fc | attention-query) projection, vocab padded to v_pad lanes
    fc_w = jnp.zeros((H, v_pad), jnp.float32).at[:, :V_out].set(uni((H, V_out), s))
    fc_b = jnp.full((1, v_pad), -1e30, jnp.float32).at[:, :V_out].set(uni((1, V_out), s))
    fc_attn_w = jnp.concatenate([fc_w, attn_wh_t], axis=1)                 # (H, v_pad + H)
    fc_attn_b = jnp.concatenate([fc_b, jnp.zeros((1, H), jnp.float32)], axis=1)

    return dict(
        vocab_out=V_out,
        enc_emb=enc_emb,                                  # f32 (XLA lookup)
        enc_wih_t=uni((E, 4 * H), s).astype(bf16),        # bf16 (hoisted XLA matmul)
        enc_whh_t=uni((H, 4 * H), s).astype(bf16),        # bf16 (kernel MXU)
        enc_b=uni((1, 4 * H), s),                         # b_ih + b_hh combined
        dec_emb=dec_emb.astype(bf16),
        attn_wh_t=attn_wh_t.astype(bf16),
        attn_we_t=attn_we_t.astype(bf16),
        attn_b=uni((1, H), s),
        attn_v=uni((1, H), s),
        dec_w_fused=dec_w_fused.astype(bf16),
        dec_b=uni((1, 4 * H), s),                         # b_ih + b_hh combined
        fc_attn_w=fc_attn_w.astype(bf16),
        fc_attn_b=fc_attn_b,
    )


if __name__ == "__main__":
    B, S_SRC, T_TGT = 2, 8, 6
    V_IN, V_OUT, E, H = 32, 32, 128, 128

    key = jax.random.PRNGKey(0)
    k_params, k_src, k_tgt = jax.random.split(key, 3)
    params = make_params(k_params, V_IN, V_OUT, E, H)

    src = jax.random.randint(k_src, (B, S_SRC), 0, V_IN, dtype=jnp.int32)
    tgt = jax.random.randint(k_tgt, (B, T_TGT), 0, V_OUT, dtype=jnp.int32)

    out = seq2seq_forward(params, src, tgt, teacher_forcing_ratio=0.8)
    out = jax.block_until_ready(out)
    assert out.shape == (B, T_TGT, V_OUT)
    print("KERNEL_OK")
</pallas_src>

<mosaic_0001>
module attributes {stable_mosaic.version = 11 : i64} {
  func.func @enc_kernel(%arg0: memref<8x8x512xf32, #tpu.memory_space<vmem>>, %arg1: memref<128x512xbf16, #tpu.memory_space<vmem>>, %arg2: memref<8x8x128xf32, #tpu.memory_space<vmem>>, %arg3: memref<8x128xf32, #tpu.memory_space<vmem>>) attributes {dimension_semantics = [], scalar_prefetch = 0 : i64, scratch_operands = 0 : i64, tpu.core_type = #tpu.core_type<tc>} {
    %cst = arith.constant 0.000000e+00 : f32
    %0 = vector.broadcast %cst : f32 to vector<8x128xf32>
    %c0 = arith.constant 0 : index
    %c0_0 = arith.constant 0 : index
    %c0_1 = arith.constant 0 : index
    %1 = vector.load %arg0[%c0, %c0_0, %c0_1] : memref<8x8x512xf32, #tpu.memory_space<vmem>>, vector<1x8x512xf32>
    %2 = vector.shape_cast %1 : vector<1x8x512xf32> to vector<8x512xf32>
    %3 = vector.extract_strided_slice %2 {offsets = [0, 0], sizes = [8, 128], strides = [1, 1]} : vector<8x512xf32> to vector<8x128xf32>
    %4 = arith.negf %3 : vector<8x128xf32>
    %5 = math.exp %4 : vector<8x128xf32>
    %cst_2 = arith.constant 1.000000e+00 : f32
    %6 = vector.broadcast %cst_2 : f32 to vector<8x128xf32>
    %7 = arith.addf %6, %5 : vector<8x128xf32>
    %8 = arith.divf %6, %7 : vector<8x128xf32>
    %9 = vector.extract_strided_slice %2 {offsets = [0, 128], sizes = [8, 128], strides = [1, 1]} : vector<8x512xf32> to vector<8x128xf32>
    %10 = arith.negf %9 : vector<8x128xf32>
    %11 = math.exp %10 : vector<8x128xf32>
    %cst_3 = arith.constant 1.000000e+00 : f32
    %12 = vector.broadcast %cst_3 : f32 to vector<8x128xf32>
    %13 = arith.addf %12, %11 : vector<8x128xf32>
    %14 = arith.divf %12, %13 : vector<8x128xf32>
    %15 = vector.extract_strided_slice %2 {offsets = [0, 256], sizes = [8, 128], strides = [1, 1]} : vector<8x512xf32> to vector<8x128xf32>
    %16 = math.tanh %15 : vector<8x128xf32>
    %17 = vector.extract_strided_slice %2 {offsets = [0, 384], sizes = [8, 128], strides = [1, 1]} : vector<8x512xf32> to vector<8x128xf32>
    %18 = arith.negf %17 : vector<8x128xf32>
    %19 = math.exp %18 : vector<8x128xf32>
    %cst_4 = arith.constant 1.000000e+00 : f32
    %20 = vector.broadcast %cst_4 : f32 to vector<8x128xf32>
    %21 = arith.addf %20, %19 : vector<8x128xf32>
    %22 = arith.divf %20, %21 : vector<8x128xf32>
    %23 = arith.mulf %14, %0 : vector<8x128xf32>
    %24 = arith.mulf %8, %16 : vector<8x128xf32>
    %25 = arith.addf %23, %24 : vector<8x128xf32>
    %26 = math.tanh %25 : vector<8x128xf32>
    %27 = arith.mulf %22, %26 : vector<8x128xf32>
    %c0_5 = arith.constant 0 : index
    %c0_6 = arith.constant 0 : index
    %c0_7 = arith.constant 0 : index
    %28 = vector.load %arg2[%c0_5, %c0_6, %c0_7] : memref<8x8x128xf32, #tpu.memory_space<vmem>>, vector<1x8x128xf32>
    %29 = vector.shape_cast %28 : vector<1x8x128xf32> to vector<8x128xf32>
    %30 = vector.shape_cast %27 : vector<8x128xf32> to vector<1x8x128xf32>
    tpu.vector_store %arg2[%c0_5, %c0_6, %c0_7], %30 {strides = array<i32>} : memref<8x8x128xf32, #tpu.memory_space<vmem>>, vector<1x8x128xf32>,
    %c1 = arith.constant 1 : index
    %c0_8 = arith.constant 0 : index
    %c0_9 = arith.constant 0 : index
    %31 = vector.load %arg0[%c1, %c0_8, %c0_9] : memref<8x8x512xf32, #tpu.memory_space<vmem>>, vector<1x8x512xf32>
    %32 = vector.shape_cast %31 : vector<1x8x512xf32> to vector<8x512xf32>
    %33 = arith.truncf %27 : vector<8x128xf32> to vector<8x128xbf16>
    %c0_10 = arith.constant 0 : index
    %c0_11 = arith.constant 0 : index
    %34 = vector.load %arg1[%c0_10, %c0_11] : memref<128x512xbf16, #tpu.memory_space<vmem>>, vector<128x512xbf16>
    %cst_12 = arith.constant dense<0.000000e+00> : vector<8x512xf32>
    %35 = tpu.matmul %33, %34, %cst_12 {dimension_numbers = #tpu.dot_dimension_numbers<[1], [0], [0], [1], [0, 0, 1, 1], [], []>} : vector<8x128xbf16>, vector<128x512xbf16>, vector<8x512xf32> -> vector<8x512xf32>
    %36 = arith.addf %32, %35 : vector<8x512xf32>
    %37 = vector.extract_strided_slice %36 {offsets = [0, 0], sizes = [8, 128], strides = [1, 1]} : vector<8x512xf32> to vector<8x128xf32>
    %38 = arith.negf %37 : vector<8x128xf32>
    %39 = math.exp %38 : vector<8x128xf32>
    %cst_13 = arith.constant 1.000000e+00 : f32
    %40 = vector.broadcast %cst_13 : f32 to vector<8x128xf32>
    %41 = arith.addf %40, %39 : vector<8x128xf32>
    %42 = arith.divf %40, %41 : vector<8x128xf32>
    %43 = vector.extract_strided_slice %36 {offsets = [0, 128], sizes = [8, 128], strides = [1, 1]} : vector<8x512xf32> to vector<8x128xf32>
    %44 = arith.negf %43 : vector<8x128xf32>
    %45 = math.exp %44 : vector<8x128xf32>
    %cst_14 = arith.constant 1.000000e+00 : f32
    %46 = vector.broadcast %cst_14 : f32 to vector<8x128xf32>
    %47 = arith.addf %46, %45 : vector<8x128xf32>
    %48 = arith.divf %46, %47 : vector<8x128xf32>
    %49 = vector.extract_strided_slice %36 {offsets = [0, 256], sizes = [8, 128], strides = [1, 1]} : vector<8x512xf32> to vector<8x128xf32>
    %50 = math.tanh %49 : vector<8x128xf32>
    %51 = vector.extract_strided_slice %36 {offsets = [0, 384], sizes = [8, 128], strides = [1, 1]} : vector<8x512xf32> to vector<8x128xf32>
    %52 = arith.negf %51 : vector<8x128xf32>
    %53 = math.exp %52 : vector<8x128xf32>
    %cst_15 = arith.constant 1.000000e+00 : f32
    %54 = vector.broadcast %cst_15 : f32 to vector<8x128xf32>
    %55 = arith.addf %54, %53 : vector<8x128xf32>
    %56 = arith.divf %54, %55 : vector<8x128xf32>
    %57 = arith.mulf %48, %25 : vector<8x128xf32>
    %58 = arith.mulf %42, %50 : vector<8x128xf32>
    %59 = arith.addf %57, %58 : vector<8x128xf32>
    %60 = math.tanh %59 : vector<8x128xf32>
    %61 = arith.mulf %56, %60 : vector<8x128xf32>
    %c1_16 = arith.constant 1 : index
    %c0_17 = arith.constant 0 : index
    %c0_18 = arith.constant 0 : index
    %62 = vector.load %arg2[%c1_16, %c0_17, %c0_18] : memref<8x8x128xf32, #tpu.memory_space<vmem>>, vector<1x8x128xf32>
    %63 = vector.shape_cast %62 : vector<1x8x128xf32> to vector<8x128xf32>
    %64 = vector.shape_cast %61 : vector<8x128xf32> to vector<1x8x128xf32>
    tpu.vector_store %arg2[%c1_16, %c0_17, %c0_18], %64 {strides = array<i32>} : memref<8x8x128xf32, #tpu.memory_space<vmem>>, vector<1x8x128xf32>,
    %c2 = arith.constant 2 : index
    %c0_19 = arith.constant 0 : index
    %c0_20 = arith.constant 0 : index
    %65 = vector.load %arg0[%c2, %c0_19, %c0_20] : memref<8x8x512xf32, #tpu.memory_space<vmem>>, vector<1x8x512xf32>
    %66 = vector.shape_cast %65 : vector<1x8x512xf32> to vector<8x512xf32>
    %67 = arith.truncf %61 : vector<8x128xf32> to vector<8x128xbf16>
    %c0_21 = arith.constant 0 : index
    %c0_22 = arith.constant 0 : index
    %68 = vector.load %arg1[%c0_21, %c0_22] : memref<128x512xbf16, #tpu.memory_space<vmem>>, vector<128x512xbf16>
    %cst_23 = arith.constant dense<0.000000e+00> : vector<8x512xf32>
    %69 = tpu.matmul %67, %68, %cst_23 {dimension_numbers = #tpu.dot_dimension_numbers<[1], [0], [0], [1], [0, 0, 1, 1], [], []>} : vector<8x128xbf16>, vector<128x512xbf16>, vector<8x512xf32> -> vector<8x512xf32>
    %70 = arith.addf %66, %69 : vector<8x512xf32>
    %71 = vector.extract_strided_slice %70 {offsets = [0, 0], sizes = [8, 128], strides = [1, 1]} : vector<8x512xf32> to vector<8x128xf32>
    %72 = arith.negf %71 : vector<8x128xf32>
    %73 = math.exp %72 : vector<8x128xf32>
    %cst_24 = arith.constant 1.000000e+00 : f32
    %74 = vector.broadcast %cst_24 : f32 to vector<8x128xf32>
    %75 = arith.addf %74, %73 : vector<8x128xf32>
    %76 = arith.divf %74, %75 : vector<8x128xf32>
    %77 = vector.extract_strided_slice %70 {offsets = [0, 128], sizes = [8, 128], strides = [1, 1]} : vector<8x512xf32> to vector<8x128xf32>
    %78 = arith.negf %77 : vector<8x128xf32>
    %79 = math.exp %78 : vector<8x128xf32>
    %cst_25 = arith.constant 1.000000e+00 : f32
    %80 = vector.broadcast %cst_25 : f32 to vector<8x128xf32>
    %81 = arith.addf %80, %79 : vector<8x128xf32>
    %82 = arith.divf %80, %81 : vector<8x128xf32>
    %83 = vector.extract_strided_slice %70 {offsets = [0, 256], sizes = [8, 128], strides = [1, 1]} : vector<8x512xf32> to vector<8x128xf32>
    %84 = math.tanh %83 : vector<8x128xf32>
    %85 = vector.extract_strided_slice %70 {offsets = [0, 384], sizes = [8, 128], strides = [1, 1]} : vector<8x512xf32> to vector<8x128xf32>
    %86 = arith.negf %85 : vector<8x128xf32>
    %87 = math.exp %86 : vector<8x128xf32>
    %cst_26 = arith.constant 1.000000e+00 : f32
    %88 = vector.broadcast %cst_26 : f32 to vector<8x128xf32>
    %89 = arith.addf %88, %87 : vector<8x128xf32>
    %90 = arith.divf %88, %89 : vector<8x128xf32>
    %91 = arith.mulf %82, %59 : vector<8x128xf32>
    %92 = arith.mulf %76, %84 : vector<8x128xf32>
    %93 = arith.addf %91, %92 : vector<8x128xf32>
    %94 = math.tanh %93 : vector<8x128xf32>
    %95 = arith.mulf %90, %94 : vector<8x128xf32>
    %c2_27 = arith.constant 2 : index
    %c0_28 = arith.constant 0 : index
    %c0_29 = arith.constant 0 : index
    %96 = vector.load %arg2[%c2_27, %c0_28, %c0_29] : memref<8x8x128xf32, #tpu.memory_space<vmem>>, vector<1x8x128xf32>
    %97 = vector.shape_cast %96 : vector<1x8x128xf32> to vector<8x128xf32>
    %98 = vector.shape_cast %95 : vector<8x128xf32> to vector<1x8x128xf32>
    tpu.vector_store %arg2[%c2_27, %c0_28, %c0_29], %98 {strides = array<i32>} : memref<8x8x128xf32, #tpu.memory_space<vmem>>, vector<1x8x128xf32>,
    %c3 = arith.constant 3 : index
    %c0_30 = arith.constant 0 : index
    %c0_31 = arith.constant 0 : index
    %99 = vector.load %arg0[%c3, %c0_30, %c0_31] : memref<8x8x512xf32, #tpu.memory_space<vmem>>, vector<1x8x512xf32>
    %100 = vector.shape_cast %99 : vector<1x8x512xf32> to vector<8x512xf32>
    %101 = arith.truncf %95 : vector<8x128xf32> to vector<8x128xbf16>
    %c0_32 = arith.constant 0 : index
    %c0_33 = arith.constant 0 : index
    %102 = vector.load %arg1[%c0_32, %c0_33] : memref<128x512xbf16, #tpu.memory_space<vmem>>, vector<128x512xbf16>
    %cst_34 = arith.constant dense<0.000000e+00> : vector<8x512xf32>
    %103 = tpu.matmul %101, %102, %cst_34 {dimension_numbers = #tpu.dot_dimension_numbers<[1], [0], [0], [1], [0, 0, 1, 1], [], []>} : vector<8x128xbf16>, vector<128x512xbf16>, vector<8x512xf32> -> vector<8x512xf32>
    %104 = arith.addf %100, %103 : vector<8x512xf32>
    %105 = vector.extract_strided_slice %104 {offsets = [0, 0], sizes = [8, 128], strides = [1, 1]} : vector<8x512xf32> to vector<8x128xf32>
    %106 = arith.negf %105 : vector<8x128xf32>
    %107 = math.exp %106 : vector<8x128xf32>
    %cst_35 = arith.constant 1.000000e+00 : f32
    %108 = vector.broadcast %cst_35 : f32 to vector<8x128xf32>
    %109 = arith.addf %108, %107 : vector<8x128xf32>
    %110 = arith.divf %108, %109 : vector<8x128xf32>
    %111 = vector.extract_strided_slice %104 {offsets = [0, 128], sizes = [8, 128], strides = [1, 1]} : vector<8x512xf32> to vector<8x128xf32>
    %112 = arith.negf %111 : vector<8x128xf32>
    %113 = math.exp %112 : vector<8x128xf32>
    %cst_36 = arith.constant 1.000000e+00 : f32
    %114 = vector.broadcast %cst_36 : f32 to vector<8x128xf32>
    %115 = arith.addf %114, %113 : vector<8x128xf32>
    %116 = arith.divf %114, %115 : vector<8x128xf32>
    %117 = vector.extract_strided_slice %104 {offsets = [0, 256], sizes = [8, 128], strides = [1, 1]} : vector<8x512xf32> to vector<8x128xf32>
    %118 = math.tanh %117 : vector<8x128xf32>
    %119 = vector.extract_strided_slice %104 {offsets = [0, 384], sizes = [8, 128], strides = [1, 1]} : vector<8x512xf32> to vector<8x128xf32>
    %120 = arith.negf %119 : vector<8x128xf32>
    %121 = math.exp %120 : vector<8x128xf32>
    %cst_37 = arith.constant 1.000000e+00 : f32
    %122 = vector.broadcast %cst_37 : f32 to vector<8x128xf32>
    %123 = arith.addf %122, %121 : vector<8x128xf32>
    %124 = arith.divf %122, %123 : vector<8x128xf32>
    %125 = arith.mulf %116, %93 : vector<8x128xf32>
    %126 = arith.mulf %110, %118 : vector<8x128xf32>
    %127 = arith.addf %125, %126 : vector<8x128xf32>
    %128 = math.tanh %127 : vector<8x128xf32>
    %129 = arith.mulf %124, %128 : vector<8x128xf32>
    %c3_38 = arith.constant 3 : index
    %c0_39 = arith.constant 0 : index
    %c0_40 = arith.constant 0 : index
    %130 = vector.load %arg2[%c3_38, %c0_39, %c0_40] : memref<8x8x128xf32, #tpu.memory_space<vmem>>, vector<1x8x128xf32>
    %131 = vector.shape_cast %130 : vector<1x8x128xf32> to vector<8x128xf32>
    %132 = vector.shape_cast %129 : vector<8x128xf32> to vector<1x8x128xf32>
    tpu.vector_store %arg2[%c3_38, %c0_39, %c0_40], %132 {strides = array<i32>} : memref<8x8x128xf32, #tpu.memory_space<vmem>>, vector<1x8x128xf32>,
    %c4 = arith.constant 4 : index
    %c0_41 = arith.constant 0 : index
    %c0_42 = arith.constant 0 : index
    %133 = vector.load %arg0[%c4, %c0_41, %c0_42] : memref<8x8x512xf32, #tpu.memory_space<vmem>>, vector<1x8x512xf32>
    %134 = vector.shape_cast %133 : vector<1x8x512xf32> to vector<8x512xf32>
    %135 = arith.truncf %129 : vector<8x128xf32> to vector<8x128xbf16>
    %c0_43 = arith.constant 0 : index
    %c0_44 = arith.constant 0 : index
    %136 = vector.load %arg1[%c0_43, %c0_44] : memref<128x512xbf16, #tpu.memory_space<vmem>>, vector<128x512xbf16>
    %cst_45 = arith.constant dense<0.000000e+00> : vector<8x512xf32>
    %137 = tpu.matmul %135, %136, %cst_45 {dimension_numbers = #tpu.dot_dimension_numbers<[1], [0], [0], [1], [0, 0, 1, 1], [], []>} : vector<8x128xbf16>, vector<128x512xbf16>, vector<8x512xf32> -> vector<8x512xf32>
    %138 = arith.addf %134, %137 : vector<8x512xf32>
    %139 = vector.extract_strided_slice %138 {offsets = [0, 0], sizes = [8, 128], strides = [1, 1]} : vector<8x512xf32> to vector<8x128xf32>
    %140 = arith.negf %139 : vector<8x128xf32>
    %141 = math.exp %140 : vector<8x128xf32>
    %cst_46 = arith.constant 1.000000e+00 : f32
    %142 = vector.broadcast %cst_46 : f32 to vector<8x128xf32>
    %143 = arith.addf %142, %141 : vector<8x128xf32>
    %144 = arith.divf %142, %143 : vector<8x128xf32>
    %145 = vector.extract_strided_slice %138 {offsets = [0, 128], sizes = [8, 128], strides = [1, 1]} : vector<8x512xf32> to vector<8x128xf32>
    %146 = arith.negf %145 : vector<8x128xf32>
    %147 = math.exp %146 : vector<8x128xf32>
    %cst_47 = arith.constant 1.000000e+00 : f32
    %148 = vector.broadcast %cst_47 : f32 to vector<8x128xf32>
    %149 = arith.addf %148, %147 : vector<8x128xf32>
    %150 = arith.divf %148, %149 : vector<8x128xf32>
    %151 = vector.extract_strided_slice %138 {offsets = [0, 256], sizes = [8, 128], strides = [1, 1]} : vector<8x512xf32> to vector<8x128xf32>
    %152 = math.tanh %151 : vector<8x128xf32>
    %153 = vector.extract_strided_slice %138 {offsets = [0, 384], sizes = [8, 128], strides = [1, 1]} : vector<8x512xf32> to vector<8x128xf32>
    %154 = arith.negf %153 : vector<8x128xf32>
    %155 = math.exp %154 : vector<8x128xf32>
    %cst_48 = arith.constant 1.000000e+00 : f32
    %156 = vector.broadcast %cst_48 : f32 to vector<8x128xf32>
    %157 = arith.addf %156, %155 : vector<8x128xf32>
    %158 = arith.divf %156, %157 : vector<8x128xf32>
    %159 = arith.mulf %150, %127 : vector<8x128xf32>
    %160 = arith.mulf %144, %152 : vector<8x128xf32>
    %161 = arith.addf %159, %160 : vector<8x128xf32>
    %162 = math.tanh %161 : vector<8x128xf32>
    %163 = arith.mulf %158, %162 : vector<8x128xf32>
    %c4_49 = arith.constant 4 : index
    %c0_50 = arith.constant 0 : index
    %c0_51 = arith.constant 0 : index
    %164 = vector.load %arg2[%c4_49, %c0_50, %c0_51] : memref<8x8x128xf32, #tpu.memory_space<vmem>>, vector<1x8x128xf32>
    %165 = vector.shape_cast %164 : vector<1x8x128xf32> to vector<8x128xf32>
    %166 = vector.shape_cast %163 : vector<8x128xf32> to vector<1x8x128xf32>
    tpu.vector_store %arg2[%c4_49, %c0_50, %c0_51], %166 {strides = array<i32>} : memref<8x8x128xf32, #tpu.memory_space<vmem>>, vector<1x8x128xf32>,
    %c5 = arith.constant 5 : index
    %c0_52 = arith.constant 0 : index
    %c0_53 = arith.constant 0 : index
    %167 = vector.load %arg0[%c5, %c0_52, %c0_53] : memref<8x8x512xf32, #tpu.memory_space<vmem>>, vector<1x8x512xf32>
    %168 = vector.shape_cast %167 : vector<1x8x512xf32> to vector<8x512xf32>
    %169 = arith.truncf %163 : vector<8x128xf32> to vector<8x128xbf16>
    %c0_54 = arith.constant 0 : index
    %c0_55 = arith.constant 0 : index
    %170 = vector.load %arg1[%c0_54, %c0_55] : memref<128x512xbf16, #tpu.memory_space<vmem>>, vector<128x512xbf16>
    %cst_56 = arith.constant dense<0.000000e+00> : vector<8x512xf32>
    %171 = tpu.matmul %169, %170, %cst_56 {dimension_numbers = #tpu.dot_dimension_numbers<[1], [0], [0], [1], [0, 0, 1, 1], [], []>} : vector<8x128xbf16>, vector<128x512xbf16>, vector<8x512xf32> -> vector<8x512xf32>
    %172 = arith.addf %168, %171 : vector<8x512xf32>
    %173 = vector.extract_strided_slice %172 {offsets = [0, 0], sizes = [8, 128], strides = [1, 1]} : vector<8x512xf32> to vector<8x128xf32>
    %174 = arith.negf %173 : vector<8x128xf32>
    %175 = math.exp %174 : vector<8x128xf32>
    %cst_57 = arith.constant 1.000000e+00 : f32
    %176 = vector.broadcast %cst_57 : f32 to vector<8x128xf32>
    %177 = arith.addf %176, %175 : vector<8x128xf32>
    %178 = arith.divf %176, %177 : vector<8x128xf32>
    %179 = vector.extract_strided_slice %172 {offsets = [0, 128], sizes = [8, 128], strides = [1, 1]} : vector<8x512xf32> to vector<8x128xf32>
    %180 = arith.negf %179 : vector<8x128xf32>
    %181 = math.exp %180 : vector<8x128xf32>
    %cst_58 = arith.constant 1.000000e+00 : f32
    %182 = vector.broadcast %cst_58 : f32 to vector<8x128xf32>
    %183 = arith.addf %182, %181 : vector<8x128xf32>
    %184 = arith.divf %182, %183 : vector<8x128xf32>
    %185 = vector.extract_strided_slice %172 {offsets = [0, 256], sizes = [8, 128], strides = [1, 1]} : vector<8x512xf32> to vector<8x128xf32>
    %186 = math.tanh %185 : vector<8x128xf32>
    %187 = vector.extract_strided_slice %172 {offsets = [0, 384], sizes = [8, 128], strides = [1, 1]} : vector<8x512xf32> to vector<8x128xf32>
    %188 = arith.negf %187 : vector<8x128xf32>
    %189 = math.exp %188 : vector<8x128xf32>
    %cst_59 = arith.constant 1.000000e+00 : f32
    %190 = vector.broadcast %cst_59 : f32 to vector<8x128xf32>
    %191 = arith.addf %190, %189 : vector<8x128xf32>
    %192 = arith.divf %190, %191 : vector<8x128xf32>
    %193 = arith.mulf %184, %161 : vector<8x128xf32>
    %194 = arith.mulf %178, %186 : vector<8x128xf32>
    %195 = arith.addf %193, %194 : vector<8x128xf32>
    %196 = math.tanh %195 : vector<8x128xf32>
    %197 = arith.mulf %192, %196 : vector<8x128xf32>
    %c5_60 = arith.constant 5 : index
    %c0_61 = arith.constant 0 : index
    %c0_62 = arith.constant 0 : index
    %198 = vector.load %arg2[%c5_60, %c0_61, %c0_62] : memref<8x8x128xf32, #tpu.memory_space<vmem>>, vector<1x8x128xf32>
    %199 = vector.shape_cast %198 : vector<1x8x128xf32> to vector<8x128xf32>
    %200 = vector.shape_cast %197 : vector<8x128xf32> to vector<1x8x128xf32>
    tpu.vector_store %arg2[%c5_60, %c0_61, %c0_62], %200 {strides = array<i32>} : memref<8x8x128xf32, #tpu.memory_space<vmem>>, vector<1x8x128xf32>,
    %c6 = arith.constant 6 : index
    %c0_63 = arith.constant 0 : index
    %c0_64 = arith.constant 0 : index
    %201 = vector.load %arg0[%c6, %c0_63, %c0_64] : memref<8x8x512xf32, #tpu.memory_space<vmem>>, vector<1x8x512xf32>
    %202 = vector.shape_cast %201 : vector<1x8x512xf32> to vector<8x512xf32>
    %203 = arith.truncf %197 : vector<8x128xf32> to vector<8x128xbf16>
    %c0_65 = arith.constant 0 : index
    %c0_66 = arith.constant 0 : index
    %204 = vector.load %arg1[%c0_65, %c0_66] : memref<128x512xbf16, #tpu.memory_space<vmem>>, vector<128x512xbf16>
    %cst_67 = arith.constant dense<0.000000e+00> : vector<8x512xf32>
    %205 = tpu.matmul %203, %204, %cst_67 {dimension_numbers = #tpu.dot_dimension_numbers<[1], [0], [0], [1], [0, 0, 1, 1], [], []>} : vector<8x128xbf16>, vector<128x512xbf16>, vector<8x512xf32> -> vector<8x512xf32>
    %206 = arith.addf %202, %205 : vector<8x512xf32>
    %207 = vector.extract_strided_slice %206 {offsets = [0, 0], sizes = [8, 128], strides = [1, 1]} : vector<8x512xf32> to vector<8x128xf32>
    %208 = arith.negf %207 : vector<8x128xf32>
    %209 = math.exp %208 : vector<8x128xf32>
    %cst_68 = arith.constant 1.000000e+00 : f32
    %210 = vector.broadcast %cst_68 : f32 to vector<8x128xf32>
    %211 = arith.addf %210, %209 : vector<8x128xf32>
    %212 = arith.divf %210, %211 : vector<8x128xf32>
    %213 = vector.extract_strided_slice %206 {offsets = [0, 128], sizes = [8, 128], strides = [1, 1]} : vector<8x512xf32> to vector<8x128xf32>
    %214 = arith.negf %213 : vector<8x128xf32>
    %215 = math.exp %214 : vector<8x128xf32>
    %cst_69 = arith.constant 1.000000e+00 : f32
    %216 = vector.broadcast %cst_69 : f32 to vector<8x128xf32>
    %217 = arith.addf %216, %215 : vector<8x128xf32>
    %218 = arith.divf %216, %217 : vector<8x128xf32>
    %219 = vector.extract_strided_slice %206 {offsets = [0, 256], sizes = [8, 128], strides = [1, 1]} : vector<8x512xf32> to vector<8x128xf32>
    %220 = math.tanh %219 : vector<8x128xf32>
    %221 = vector.extract_strided_slice %206 {offsets = [0, 384], sizes = [8, 128], strides = [1, 1]} : vector<8x512xf32> to vector<8x128xf32>
    %222 = arith.negf %221 : vector<8x128xf32>
    %223 = math.exp %222 : vector<8x128xf32>
    %cst_70 = arith.constant 1.000000e+00 : f32
    %224 = vector.broadcast %cst_70 : f32 to vector<8x128xf32>
    %225 = arith.addf %224, %223 : vector<8x128xf32>
    %226 = arith.divf %224, %225 : vector<8x128xf32>
    %227 = arith.mulf %218, %195 : vector<8x128xf32>
    %228 = arith.mulf %212, %220 : vector<8x128xf32>
    %229 = arith.addf %227, %228 : vector<8x128xf32>
    %230 = math.tanh %229 : vector<8x128xf32>
    %231 = arith.mulf %226, %230 : vector<8x128xf32>
    %c6_71 = arith.constant 6 : index
    %c0_72 = arith.constant 0 : index
    %c0_73 = arith.constant 0 : index
    %232 = vector.load %arg2[%c6_71, %c0_72, %c0_73] : memref<8x8x128xf32, #tpu.memory_space<vmem>>, vector<1x8x128xf32>
    %233 = vector.shape_cast %232 : vector<1x8x128xf32> to vector<8x128xf32>
    %234 = vector.shape_cast %231 : vector<8x128xf32> to vector<1x8x128xf32>
    tpu.vector_store %arg2[%c6_71, %c0_72, %c0_73], %234 {strides = array<i32>} : memref<8x8x128xf32, #tpu.memory_space<vmem>>, vector<1x8x128xf32>,
    %c7 = arith.constant 7 : index
    %c0_74 = arith.constant 0 : index
    %c0_75 = arith.constant 0 : index
    %235 = vector.load %arg0[%c7, %c0_74, %c0_75] : memref<8x8x512xf32, #tpu.memory_space<vmem>>, vector<1x8x512xf32>
    %236 = vector.shape_cast %235 : vector<1x8x512xf32> to vector<8x512xf32>
    %237 = arith.truncf %231 : vector<8x128xf32> to vector<8x128xbf16>
    %c0_76 = arith.constant 0 : index
    %c0_77 = arith.constant 0 : index
    %238 = vector.load %arg1[%c0_76, %c0_77] : memref<128x512xbf16, #tpu.memory_space<vmem>>, vector<128x512xbf16>
    %cst_78 = arith.constant dense<0.000000e+00> : vector<8x512xf32>
    %239 = tpu.matmul %237, %238, %cst_78 {dimension_numbers = #tpu.dot_dimension_numbers<[1], [0], [0], [1], [0, 0, 1, 1], [], []>} : vector<8x128xbf16>, vector<128x512xbf16>, vector<8x512xf32> -> vector<8x512xf32>
    %240 = arith.addf %236, %239 : vector<8x512xf32>
    %241 = vector.extract_strided_slice %240 {offsets = [0, 0], sizes = [8, 128], strides = [1, 1]} : vector<8x512xf32> to vector<8x128xf32>
    %242 = arith.negf %241 : vector<8x128xf32>
    %243 = math.exp %242 : vector<8x128xf32>
    %cst_79 = arith.constant 1.000000e+00 : f32
    %244 = vector.broadcast %cst_79 : f32 to vector<8x128xf32>
    %245 = arith.addf %244, %243 : vector<8x128xf32>
    %246 = arith.divf %244, %245 : vector<8x128xf32>
    %247 = vector.extract_strided_slice %240 {offsets = [0, 128], sizes = [8, 128], strides = [1, 1]} : vector<8x512xf32> to vector<8x128xf32>
    %248 = arith.negf %247 : vector<8x128xf32>
    %249 = math.exp %248 : vector<8x128xf32>
    %cst_80 = arith.constant 1.000000e+00 : f32
    %250 = vector.broadcast %cst_80 : f32 to vector<8x128xf32>
    %251 = arith.addf %250, %249 : vector<8x128xf32>
    %252 = arith.divf %250, %251 : vector<8x128xf32>
    %253 = vector.extract_strided_slice %240 {offsets = [0, 256], sizes = [8, 128], strides = [1, 1]} : vector<8x512xf32> to vector<8x128xf32>
    %254 = math.tanh %253 : vector<8x128xf32>
    %255 = vector.extract_strided_slice %240 {offsets = [0, 384], sizes = [8, 128], strides = [1, 1]} : vector<8x512xf32> to vector<8x128xf32>
    %256 = arith.negf %255 : vector<8x128xf32>
    %257 = math.exp %256 : vector<8x128xf32>
    %cst_81 = arith.constant 1.000000e+00 : f32
    %258 = vector.broadcast %cst_81 : f32 to vector<8x128xf32>
    %259 = arith.addf %258, %257 : vector<8x128xf32>
    %260 = arith.divf %258, %259 : vector<8x128xf32>
    %261 = arith.mulf %252, %229 : vector<8x128xf32>
    %262 = arith.mulf %246, %254 : vector<8x128xf32>
    %263 = arith.addf %261, %262 : vector<8x128xf32>
    %264 = math.tanh %263 : vector<8x128xf32>
    %265 = arith.mulf %260, %264 : vector<8x128xf32>
    %c7_82 = arith.constant 7 : index
    %c0_83 = arith.constant 0 : index
    %c0_84 = arith.constant 0 : index
    %266 = vector.load %arg2[%c7_82, %c0_83, %c0_84] : memref<8x8x128xf32, #tpu.memory_space<vmem>>, vector<1x8x128xf32>
    %267 = vector.shape_cast %266 : vector<1x8x128xf32> to vector<8x128xf32>
    %268 = vector.shape_cast %265 : vector<8x128xf32> to vector<1x8x128xf32>
    tpu.vector_store %arg2[%c7_82, %c0_83, %c0_84], %268 {strides = array<i32>} : memref<8x8x128xf32, #tpu.memory_space<vmem>>, vector<1x8x128xf32>,
    %c0_85 = arith.constant 0 : index
    %c0_86 = arith.constant 0 : index
    %269 = vector.load %arg3[%c0_85, %c0_86] : memref<8x128xf32, #tpu.memory_space<vmem>>, vector<8x128xf32>
    tpu.vector_store %arg3[%c0_85, %c0_86], %263 {strides = array<i32>} : memref<8x128xf32, #tpu.memory_space<vmem>>, vector<8x128xf32>,
    return
  }
}

</mosaic_0001>

<bundles_post_ra>
// kernel: tpu_custom_call.1
= control target key start
LH: loop header
LB: loop body
LE: loop exit
PB: predicated region body
PF: predicated region fallthrough
CT: control target
= control target key end

     0   :  { %9 = vsyncpa [#allocation3], 0  ;;  %s3324_s0 = inlined_call_operand.hbm [shape: f32[8,8,512], index: 0, kind: input, shape index: {}]   ;;  %s3325_s1 = inlined_call_operand.hbm [shape: bf16[128,512], index: 1, kind: input, shape index: {}]   ;;  %s3326_s2 = inlined_call_operand.hbm [shape: f32[8,8,128], index: 2, kind: output, shape index: {0}]   ;;  %s3327_s3 = inlined_call_operand.hbm [shape: f32[8,128], index: 3, kind: output, shape index: {1}]  }
   0x1   :  { %10 = vsyncpa [#allocation6], 0 }
   0x2   :  { %11 = vsyncpa [#allocation4], 0 }
   0x3   :  { %12 = vsyncpa [#allocation9], 0  ;;  %s2855_s12 = smov [#allocation2]   ;;  %s2759_s16 = scalar_lea.hbm %s3324_s0, 4096 }
   0x4   :  { %s18_s13 = sshll.u32 %s2855_s12, 4  ;;  %p2760_p0 = scmp.ne.s32.totalorder %s3324_s0, %s2759_s16  ;;  %s19_s13 = int_to_ptr.vmem [resolvable:$true] %s18_s13 }
   0x5   :  { %p2763_p1 = scmp.lt.u32.totalorder %s2759_s16, %s3324_s0 }
   0x7   :  { %p2765_p2 = pnand %p2763_p1, %p2760_p0 }
   0x9   :  { %2768 = shalt.err (!%p2765_p2)
}
   0xa   :  { %s2769_s21 = scalar_lea.vmem %s19_s13, 4096  ;;  %p2774_p4 = scmp.lt.s32.totalorder %s19_s13, %s19_s13 }
   0xb   :  { %p2770_p3 = scmp.ne.s32.totalorder %s19_s13, %s2769_s21  ;;  %p2775_p5 = scmp.lt.s32.totalorder %s2769_s21, %s2769_s21 }
   0xd   :  { %p2776_p6 = por %p2775_p5, %p2774_p4 }
   0xf   :  { %p2777_p7 = pnand %p2776_p6, %p2770_p3 }
  0x11   :  { %2780 = shalt.err (!%p2777_p7)
}
  0x12   :  { %s2856_s22 = smov 512   ;;  %s2857_s23 = smov 32  }
  0x13   :  { %24 = dma.hbm_to_vmem [thread:$0]  %s3324_s0, 4096, %s19_s13, [#allocation3], %s2856_s22, %s2856_s22, %s2857_s23  }
  0x14   :  { %s2858_s26 = smov [#allocation5]   ;;  %s2781_s30 = scalar_lea.hbm %s3325_s1, 4096 }
  0x15   :  { %s30_s27 = sshll.u32 %s2858_s26, 4  ;;  %p2782_p8 = scmp.ne.s32.totalorder %s3325_s1, %s2781_s30  ;;  %s31_s27 = int_to_ptr.vmem [resolvable:$true] %s30_s27 }
  0x16   :  { %p2785_p9 = scmp.lt.u32.totalorder %s2781_s30, %s3325_s1 }
  0x18   :  { %p2787_p10 = pnand %p2785_p9, %p2782_p8 }
  0x1a   :  { %2790 = shalt.err (!%p2787_p10)
}
  0x1b   :  { %s2791_s8 = scalar_lea.vmem %s31_s27, 4096  ;;  %p2796_p12 = scmp.lt.s32.totalorder %s31_s27, %s31_s27 }
  0x1c   :  { %p2792_p11 = scmp.ne.s32.totalorder %s31_s27, %s2791_s8  ;;  %p2797_p13 = scmp.lt.s32.totalorder %s2791_s8, %s2791_s8 }
  0x1e   :  { %p2798_p0 = por %p2797_p13, %p2796_p12 }
  0x20   :  { %p2799_p1 = pnand %p2798_p0, %p2792_p11 }
  0x22   :  { %2802 = shalt.err (!%p2799_p1)
}
  0x23   :  { %s2859_s0 = smov 256   ;;  %s2860_s9 = smov 16  }
  0x24   :  { %36 = dma.hbm_to_vmem [thread:$0]  %s3325_s1, 4096, %s31_s27, [#allocation6], %s2859_s0, %s2859_s0, %s2860_s9  }
  0x25   :  { %2847 = dma.done.wait [#allocation3], 4096  }
  0x26   :  { %2848 = vsyncadd [#allocation3], 4294963200 }
  0x27   :  { %2849 = dma.done.wait [#allocation6], 4096  }
  0x28   :  { %2850 = vsyncadd [#allocation6], 4294963200  ;;  %v2861_v0 = vmov 0   ;;  %v2912_v1 = vld [vmem:[#allocation5 + $0x4] ss:$16 sps:$4 sm:$0xff]   ;;  %v45_v22 = vld [vmem:[#allocation2 + $0x8] sm:$0xff] }
  0x29   :  { %303 = vmatprep.mubr.bf16.mxu0 %v2861_v0  ;;  %344 = vmatprep.mubr.bf16.mxu1 %v2861_v0  ;;  %v2914_v2 = vld [vmem:[#allocation5] ss:$16 sps:$4 sm:$0xff]   ;;  %v2917_v3 = vld [vmem:[#allocation5 + $0x24] ss:$16 sps:$4 sm:$0xff]   ;;  %v2925_v6 = vld [vmem:[#allocation5 + $0xc] ss:$16 sps:$4 sm:$0xff]  }
  0x2a   :  { %271 = vmatprep.subr.bf16.mxu0 %v2912_v1  ;;  %v2920_v4 = vld [vmem:[#allocation5 + $0x20] ss:$16 sps:$4 sm:$0xff]   ;;  %v2923_v5 = vld [vmem:[#allocation5 + $0x44] ss:$16 sps:$4 sm:$0xff]   ;;  %v2927_v7 = vld [vmem:[#allocation5 + $0x8] ss:$16 sps:$4 sm:$0xff]   ;;  %312 = vmatprep.subr.bf16.mxu1 %v2925_v6 }
  0x2b   :  { %272 = vmatpush1.bf16.msra.mxu0 %v2914_v2  ;;  %v2930_v8 = vld [vmem:[#allocation5 + $0x40] ss:$16 sps:$4 sm:$0xff]   ;;  %v2934_v9 = vld [vmem:[#allocation5 + $0x64] ss:$16 sps:$4 sm:$0xff]   ;;  %313 = vmatpush1.bf16.msra.mxu1 %v2927_v7  ;;  %v2937_v10 = vld [vmem:[#allocation5 + $0x2c] ss:$16 sps:$4 sm:$0xff]  }
  0x2c   :  { %273 = vmatprep.subr.bf16.mxu0 %v2917_v3  ;;  %v2939_v11 = vld [vmem:[#allocation5 + $0x28] ss:$16 sps:$4 sm:$0xff]   ;;  %314 = vmatprep.subr.bf16.mxu1 %v2937_v10  ;;  %v2943_v12 = vld [vmem:[#allocation5 + $0x60] ss:$16 sps:$4 sm:$0xff]   ;;  %v2945_v13 = vld [vmem:[#allocation5 + $0x84] ss:$16 sps:$4 sm:$0xff]  }
  0x2d   :  { %v2947_v14 = vld [vmem:[#allocation5 + $0x4c] ss:$16 sps:$4 sm:$0xff]   ;;  %v2951_v15 = vld [vmem:[#allocation5 + $0x48] ss:$16 sps:$4 sm:$0xff]   ;;  %v2957_v17 = vld [vmem:[#allocation5 + $0x80] ss:$16 sps:$4 sm:$0xff]  }
  0x2e   :  { %v2954_v16 = vld [vmem:[#allocation5 + $0x6c] ss:$16 sps:$4 sm:$0xff]   ;;  %v2960_v18 = vld [vmem:[#allocation5 + $0xa4] ss:$16 sps:$4 sm:$0xff]   ;;  %v2963_v19 = vld [vmem:[#allocation5 + $0x68] ss:$16 sps:$4 sm:$0xff]  }
  0x2f   :  { %274 = vmatpush1.bf16.msra.mxu0 %v2920_v4  ;;  %315 = vmatpush1.bf16.msra.mxu1 %v2939_v11  ;;  %v2966_v20 = vld [vmem:[#allocation5 + $0x8c] ss:$16 sps:$4 sm:$0xff]   ;;  %v44_v21 = vld [vmem:[#allocation2] sm:$0xff]  ;;  %v2277_v25 = vmul.f32 -1.442695, %v45_v22  ;;  %v46_v35 = vld [vmem:[#allocation2 + $0x10] sm:$0xff] }
  0x30   :  { %275 = vmatprep.subr.bf16.mxu0 %v2923_v5  ;;  %316 = vmatprep.subr.bf16.mxu1 %v2947_v14  ;;  %v2968_v23 = vld [vmem:[#allocation5 + $0xa0] ss:$16 sps:$4 sm:$0xff]   ;;  %v2276_v24 = vmul.f32 -1.442695, %v44_v21  ;;  %v2971_v26 = vld [vmem:[#allocation5 + $0xc4] ss:$16 sps:$4 sm:$0xff]  }
  0x31   :  { %v2975_v27 = vld [vmem:[#allocation5 + $0x88] ss:$16 sps:$4 sm:$0xff]   ;;  %v2977_v28 = vld [vmem:[#allocation5 + $0xc0] ss:$16 sps:$4 sm:$0xff]   ;;  %v2980_v29 = vld [vmem:[#allocation5 + $0xac] ss:$16 sps:$4 sm:$0xff]  }
  0x32   :  { %2631 = vpow2.f32 %v2276_v24  ;;  %v2982_v30 = vld [vmem:[#allocation5 + $0xe4] ss:$16 sps:$4 sm:$0xff]   ;;  %v47_v31 = vld [vmem:[#allocation2 + $0x18] sm:$0xff]  ;;  %v2991_v34 = vld [vmem:[#allocation5 + $0xe0] ss:$16 sps:$4 sm:$0xff]   ;;  %s2862_s1 = smov [#allocation8]  }
  0x33   :  { %276 = vmatpush1.bf16.msra.mxu0 %v2930_v8  ;;  %317 = vmatpush1.bf16.msra.mxu1 %v2951_v15  ;;  %2633 = vpow2.f32 %v2277_v25  ;;  %v2984_v32 = vld [vmem:[#allocation5 + $0xa8] ss:$16 sps:$4 sm:$0xff]   ;;  %v2987_v33 = vld [vmem:[#allocation5 + $0xcc] ss:$16 sps:$4 sm:$0xff]   ;;  %v2278_v36 = vmul.f32 -1.442695, %v47_v31 }
  0x34   :  { %277 = vmatprep.subr.bf16.mxu0 %v2934_v9  ;;  %318 = vmatprep.subr.bf16.mxu1 %v2954_v16  ;;  %v2994_v37 = vld [vmem:[#allocation5 + $0xc8] ss:$16 sps:$4 sm:$0xff]   ;;  %v2997_v38 = vld [vmem:[#allocation5 + $0xec] ss:$16 sps:$4 sm:$0xff]   ;;  %v74_v56 = vld [vmem:[#allocation2 + $0x20] sm:$0xff]  ;;  %s2262_s12 = sshll.u32 %s2862_s1, 4  ;;  %s2263_s12 = int_to_ptr.vmem [resolvable:$true] %s2262_s12 }
  0x35   :  { %2635 = vpow2.f32 %v2278_v36  ;;  %v3002_v40 = vld [vmem:[#allocation5 + $0xe8] ss:$16 sps:$4 sm:$0xff]   ;;  %s2803_s13 = scalar_lea.vmem %s2263_s12, 128  ;;  %p2808_p3 = scmp.lt.s32.totalorder %s2263_s12, %s2263_s12 }
  0x36   :  { %2637 = vtanh.f32 %v46_v35  ;;  %v75_v57 = vld [vmem:[#allocation2 + $0x28] sm:$0xff]  ;;  %v77_v36 = vld [vmem:[#allocation2 + $0x38] sm:$0xff]  ;;  %p2804_p2 = scmp.ne.s32.totalorder %s2263_s12, %s2803_s13  ;;  %p2809_p4 = scmp.lt.s32.totalorder %s2803_s13, %s2803_s13 }
  0x37   :  { %278 = vmatpush1.bf16.msra.mxu0 %v2943_v12  ;;  %319 = vmatpush1.bf16.msra.mxu1 %v2963_v19 }
  0x38   :  { %279 = vmatprep.subr.bf16.mxu0 %v2945_v13  ;;  %320 = vmatprep.subr.bf16.mxu1 %v2966_v20  ;;  %p2810_p5 = por %p2809_p4, %p2808_p3 }
  0x3a   :  { %p2811_p6 = pnand %p2810_p5, %p2804_p2 }
  0x3b   :  { %280 = vmatpush1.bf16.msra.mxu0 %v2957_v17  ;;  %321 = vmatpush1.bf16.msra.mxu1 %v2975_v27 }
  0x3c   :  { %281 = vmatprep.subr.bf16.mxu0 %v2960_v18  ;;  %322 = vmatprep.subr.bf16.mxu1 %v2980_v29  ;;  %v2632_v39 = vpop.eup %2631 }
  0x3d   :  { %v2634_v41 = vpop.eup %2633  ;;  %v51_v42 = vadd.f32 1.0, %v2632_v39 }
  0x3e   :  { %v57_v43 = vadd.f32 1.0, %v2634_v41  ;;  %v76_v41 = vld [vmem:[#allocation2 + $0x30] sm:$0xff] }
  0x3f   :  { %282 = vmatpush1.bf16.msra.mxu0 %v2968_v23  ;;  %323 = vmatpush1.bf16.msra.mxu1 %v2984_v32  ;;  %2639 = vrcp.f32 %v51_v42  ;;  %v2636_v44 = vpop.eup %2635 }
  0x40   :  { %283 = vmatprep.subr.bf16.mxu0 %v2971_v26  ;;  %324 = vmatprep.subr.bf16.mxu1 %v2987_v33  ;;  %2641 = vrcp.f32 %v57_v43  ;;  %v2638_v45 = vpop.eup %2637  ;;  %v64_v47 = vadd.f32 1.0, %v2636_v44 }
  0x42   :  { %2643 = vrcp.f32 %v64_v47 }
  0x43   :  { %284 = vmatpush1.bf16.msra.mxu0 %v2977_v28  ;;  %325 = vmatpush1.bf16.msra.mxu1 %v2994_v37 }
  0x44   :  { %285 = vmatprep.subr.bf16.mxu0 %v2982_v30  ;;  %326 = vmatprep.subr.bf16.mxu1 %v2997_v38 }
  0x47   :  { %286 = vmatpush1.bf16.msra.mxu0 %v2991_v34  ;;  %327 = vmatpush1.bf16.msra.mxu1 %v3002_v40 }
  0x48   :  { %581 = vmatprep.subr.bf16.mxu0 %v2912_v1  ;;  %622 = vmatprep.subr.bf16.mxu1 %v2925_v6 }
  0x49   :  { %v2640_v46 = vpop.eup %2639 }
  0x4a   :  { %v2642_v48 = vpop.eup %2641  ;;  %v68_v49 = vmul.f32 %v2640_v46, %v2638_v45 }
  0x4b   :  { %v67_v50 = vmul.f32 0.0, %v2642_v48 }
  0x4c   :  { %v2644_v52 = vpop.eup %2643 }
  0x4d   :  { %v3010_v51 = vadd.f32 %v68_v49, %v67_v50 }
  0x4f   :  { %2645 = vtanh.f32 %v3010_v51 }
  0x59   :  { %v2646_v53 = vpop.eup %2645 }
  0x5a   :  { %v71_v54 = vmul.f32 %v2646_v53, %v2644_v52 }
  0x5c   :  { %72 = vst [vmem:[#allocation7] sm:$0xff] %v71_v54  ;;  %v78_v55 = vpack.c.bf16 %v71_v54, %v71_v54 }
  0x5e   :  { %304 = vmatmul.mubr.bf16.vlgmr.msra.gmra.mrb[0].mxu0 %v78_v55  ;;  %345 = vmatmul.mubr.bf16.vlgmr.msra.gmra.mrb[0].mxu1 %v78_v55 }
  0x5f   :  { %582 = vmatpush1.bf16.msra.mxu0 %v2914_v2  ;;  %623 = vmatpush1.bf16.msra.mxu1 %v2927_v7 }
  0x60   :  { %583 = vmatprep.subr.bf16.mxu0 %v2917_v3  ;;  %624 = vmatprep.subr.bf16.mxu1 %v2937_v10 }
  0x61   :  { %613 = vmatprep.mubr.bf16.mxu0 %v2861_v0  ;;  %654 = vmatprep.mubr.bf16.mxu1 %v2861_v0 }
  0x63   :  { %584 = vmatpush1.bf16.msra.mxu0 %v2920_v4  ;;  %625 = vmatpush1.bf16.msra.mxu1 %v2939_v11 }
  0x64   :  { %585 = vmatprep.subr.bf16.mxu0 %v2923_v5  ;;  %626 = vmatprep.subr.bf16.mxu1 %v2947_v14 }
  0x67   :  { %586 = vmatpush1.bf16.msra.mxu0 %v2930_v8  ;;  %627 = vmatpush1.bf16.msra.mxu1 %v2951_v15 }
  0x68   :  { %587 = vmatprep.subr.bf16.mxu0 %v2934_v9  ;;  %628 = vmatprep.subr.bf16.mxu1 %v2954_v16 }
  0x6b   :  { %588 = vmatpush1.bf16.msra.mxu0 %v2943_v12  ;;  %629 = vmatpush1.bf16.msra.mxu1 %v2963_v19 }
  0x6c   :  { %589 = vmatprep.subr.bf16.mxu0 %v2945_v13  ;;  %630 = vmatprep.subr.bf16.mxu1 %v2966_v20 }
  0x6f   :  { %590 = vmatpush1.bf16.msra.mxu0 %v2957_v17  ;;  %631 = vmatpush1.bf16.msra.mxu1 %v2975_v27 }
  0x70   :  { %591 = vmatprep.subr.bf16.mxu0 %v2960_v18  ;;  %632 = vmatprep.subr.bf16.mxu1 %v2980_v29 }
  0x73   :  { %592 = vmatpush1.bf16.msra.mxu0 %v2968_v23  ;;  %633 = vmatpush1.bf16.msra.mxu1 %v2984_v32 }
  0x74   :  { %593 = vmatprep.subr.bf16.mxu0 %v2971_v26  ;;  %634 = vmatprep.subr.bf16.mxu1 %v2987_v33 }
  0x77   :  { %594 = vmatpush1.bf16.msra.mxu0 %v2977_v28  ;;  %635 = vmatpush1.bf16.msra.mxu1 %v2994_v37 }
  0x78   :  { %595 = vmatprep.subr.bf16.mxu0 %v2982_v30  ;;  %636 = vmatprep.subr.bf16.mxu1 %v2997_v38 }
  0x7b   :  { %596 = vmatpush1.bf16.msra.mxu0 %v2991_v34  ;;  %637 = vmatpush1.bf16.msra.mxu1 %v3002_v40 }
  0x7c   :  { %891 = vmatprep.subr.bf16.mxu0 %v2912_v1  ;;  %932 = vmatprep.subr.bf16.mxu1 %v2925_v6 }
 0x131   :  { %v305_v58 = vpop.f32.mrb[0].mxu0  ;;  %v346_v59 = vpop.f32.mrb[0].mxu1 }
 0x132   :  { %v353_v60 = vadd.f32 %v305_v58, %v74_v56  ;;  %v307_v61 = vpop.f32.mrb[1].mxu0  ;;  %v348_v62 = vpop.f32.mrb[1].mxu1  ;;  %v355_v43 = vadd.f32 %v346_v59, %v76_v41 }
 0x133   :  { %v354_v63 = vadd.f32 %v307_v61, %v75_v57  ;;  %v309_v21 = vpop.f32.mrb[2].mxu0  ;;  %v350_v22 = vpop.f32.mrb[2].mxu1  ;;  %v356_v39 = vadd.f32 %v348_v62, %v77_v36  ;;  %v385_v61 = vld [vmem:[#allocation2 + $0x48] sm:$0xff] }
 0x134   :  { %v2311_v24 = vmul.f32 -1.442695, %v353_v60  ;;  %v310_v25 = vpop.f32.mrb[3].mxu0  ;;  %v351_v31 = vpop.f32.mrb[3].mxu1 }
 0x135   :  { %v2312_v35 = vmul.f32 -1.442695, %v354_v63  ;;  %v2313_v42 = vmul.f32 -1.442695, %v356_v39 }
 0x136   :  { %2647 = vpow2.f32 %v2311_v24 }
 0x137   :  { %2649 = vpow2.f32 %v2312_v35 }
 0x138   :  { %2651 = vpow2.f32 %v2313_v42 }
 0x139   :  { %2653 = vtanh.f32 %v355_v43  ;;  %v387_v43 = vld [vmem:[#allocation2 + $0x58] sm:$0xff] }
 0x140   :  { %v2648_v44 = vpop.eup %2647 }
 0x141   :  { %v2650_v45 = vpop.eup %2649  ;;  %v360_v46 = vadd.f32 1.0, %v2648_v44  ;;  %v386_v44 = vld [vmem:[#allocation2 + $0x50] sm:$0xff] }
 0x142   :  { %v366_v47 = vadd.f32 1.0, %v2650_v45  ;;  %v2652_v48 = vpop.eup %2651 }
 0x143   :  { %2655 = vrcp.f32 %v360_v46  ;;  %v2654_v49 = vpop.eup %2653  ;;  %v373_v52 = vadd.f32 1.0, %v2652_v48 }
 0x144   :  { %2657 = vrcp.f32 %v366_v47 }
 0x145   :  { %2659 = vrcp.f32 %v373_v52 }
 0x14d   :  { %v2656_v50 = vpop.eup %2655 }
 0x14e   :  { %v2658_v53 = vpop.eup %2657  ;;  %v377_v54 = vmul.f32 %v2656_v50, %v2654_v49 }
 0x14f   :  { %v376_v55 = vmul.f32 %v2658_v53, %v3010_v51  ;;  %v2660_v57 = vpop.eup %2659  ;;  %v384_v51 = vld [vmem:[#allocation2 + $0x40] sm:$0xff] }
 0x151   :  { %v3048_v56 = vadd.f32 %v377_v54, %v376_v55 }
 0x153   :  { %2661 = vtanh.f32 %v3048_v56 }
 0x15d   :  { %v2662_v58 = vpop.eup %2661 }
 0x15e   :  { %v380_v59 = vmul.f32 %v2662_v58, %v2660_v57 }
 0x160   :  { %382 = vst [vmem:[#allocation7 + $0x8] sm:$0xff] %v380_v59  ;;  %v388_v60 = vpack.c.bf16 %v380_v59, %v380_v59 }
 0x162   :  { %614 = vmatmul.mubr.bf16.vlgmr.msra.gmra.mrb[4].mxu0 %v388_v60  ;;  %655 = vmatmul.mubr.bf16.vlgmr.msra.gmra.mrb[4].mxu1 %v388_v60 }
 0x163   :  { %892 = vmatpush1.bf16.msra.mxu0 %v2914_v2  ;;  %933 = vmatpush1.bf16.msra.mxu1 %v2927_v7 }
 0x164   :  { %893 = vmatprep.subr.bf16.mxu0 %v2917_v3  ;;  %934 = vmatprep.subr.bf16.mxu1 %v2937_v10 }
 0x165   :  { %923 = vmatprep.mubr.bf16.mxu0 %v2861_v0  ;;  %964 = vmatprep.mubr.bf16.mxu1 %v2861_v0 }
 0x167   :  { %894 = vmatpush1.bf16.msra.mxu0 %v2920_v4  ;;  %935 = vmatpush1.bf16.msra.mxu1 %v2939_v11 }
 0x168   :  { %895 = vmatprep.subr.bf16.mxu0 %v2923_v5  ;;  %936 = vmatprep.subr.bf16.mxu1 %v2947_v14 }
 0x16b   :  { %896 = vmatpush1.bf16.msra.mxu0 %v2930_v8  ;;  %937 = vmatpush1.bf16.msra.mxu1 %v2951_v15 }
 0x16c   :  { %897 = vmatprep.subr.bf16.mxu0 %v2934_v9  ;;  %938 = vmatprep.subr.bf16.mxu1 %v2954_v16 }
 0x16f   :  { %898 = vmatpush1.bf16.msra.mxu0 %v2943_v12  ;;  %939 = vmatpush1.bf16.msra.mxu1 %v2963_v19 }
 0x170   :  { %899 = vmatprep.subr.bf16.mxu0 %v2945_v13  ;;  %940 = vmatprep.subr.bf16.mxu1 %v2966_v20 }
 0x173   :  { %900 = vmatpush1.bf16.msra.mxu0 %v2957_v17  ;;  %941 = vmatpush1.bf16.msra.mxu1 %v2975_v27 }
 0x174   :  { %901 = vmatprep.subr.bf16.mxu0 %v2960_v18  ;;  %942 = vmatprep.subr.bf16.mxu1 %v2980_v29 }
 0x177   :  { %902 = vmatpush1.bf16.msra.mxu0 %v2968_v23  ;;  %943 = vmatpush1.bf16.msra.mxu1 %v2984_v32 }
 0x178   :  { %903 = vmatprep.subr.bf16.mxu0 %v2971_v26  ;;  %944 = vmatprep.subr.bf16.mxu1 %v2987_v33 }
 0x17b   :  { %904 = vmatpush1.bf16.msra.mxu0 %v2977_v28  ;;  %945 = vmatpush1.bf16.msra.mxu1 %v2994_v37 }
 0x17c   :  { %905 = vmatprep.subr.bf16.mxu0 %v2982_v30  ;;  %946 = vmatprep.subr.bf16.mxu1 %v2997_v38 }
 0x17f   :  { %906 = vmatpush1.bf16.msra.mxu0 %v2991_v34  ;;  %947 = vmatpush1.bf16.msra.mxu1 %v3002_v40 }
 0x180   :  { %1201 = vmatprep.subr.bf16.mxu0 %v2912_v1  ;;  %1242 = vmatprep.subr.bf16.mxu1 %v2925_v6 }
 0x235   :  { %v615_v62 = vpop.f32.mrb[4].mxu0  ;;  %v656_v63 = vpop.f32.mrb[4].mxu1 }
 0x236   :  { %v663_v21 = vadd.f32 %v615_v62, %v384_v51  ;;  %v617_v22 = vpop.f32.mrb[5].mxu0  ;;  %v658_v24 = vpop.f32.mrb[5].mxu1  ;;  %v665_v45 = vadd.f32 %v656_v63, %v386_v44  ;;  %v3153_v44 = vld [vmem:[#allocation5 + $0x4c] ss:$16 sps:$4 sm:$0xff]  }
 0x237   :  { %v664_v25 = vadd.f32 %v617_v22, %v385_v61  ;;  %v619_v31 = vpop.f32.mrb[6].mxu0  ;;  %v660_v35 = vpop.f32.mrb[6].mxu1  ;;  %v666_v1 = vadd.f32 %v658_v24, %v387_v43  ;;  %v3145_v43 = vld [vmem:[#allocation5 + $0x28] ss:$16 sps:$4 sm:$0xff]  }
 0x238   :  { %v2346_v36 = vmul.f32 -1.442695, %v663_v21  ;;  %v620_v39 = vpop.f32.mrb[7].mxu0  ;;  %v661_v41 = vpop.f32.mrb[7].mxu1  ;;  %v3129_v31 = vld [vmem:[#allocation5 + $0xc] ss:$16 sps:$4 sm:$0xff]  }
 0x239   :  { %v2347_v42 = vmul.f32 -1.442695, %v664_v25  ;;  %v2348_v6 = vmul.f32 -1.442695, %v666_v1  ;;  %v3127_v25 = vld [vmem:[#allocation5 + $0x4] ss:$16 sps:$4 sm:$0xff]  }
 0x23a   :  { %2663 = vpow2.f32 %v2346_v36  ;;  %v3131_v35 = vld [vmem:[#allocation5] ss:$16 sps:$4 sm:$0xff]   ;;  %v3133_v36 = vld [vmem:[#allocation5 + $0x8] ss:$16 sps:$4 sm:$0xff]   ;;  %v3139_v39 = vld [vmem:[#allocation5 + $0x24] ss:$16 sps:$4 sm:$0xff]  }
 0x23b   :  { %2665 = vpow2.f32 %v2347_v42  ;;  %v3141_v41 = vld [vmem:[#allocation5 + $0x2c] ss:$16 sps:$4 sm:$0xff]   ;;  %v3143_v42 = vld [vmem:[#allocation5 + $0x20] ss:$16 sps:$4 sm:$0xff]   ;;  %v3151_v1 = vld [vmem:[#allocation5 + $0x44] ss:$16 sps:$4 sm:$0xff]  }
 0x23c   :  { %2667 = vpow2.f32 %v2348_v6  ;;  %v3155_v6 = vld [vmem:[#allocation5 + $0x40] ss:$16 sps:$4 sm:$0xff]  }
 0x23d   :  { %2669 = vtanh.f32 %v665_v45  ;;  %v3157_v45 = vld [vmem:[#allocation5 + $0x48] ss:$16 sps:$4 sm:$0xff]  }
 0x244   :  { %v2664_v46 = vpop.eup %2663 }
 0x245   :  { %v2666_v47 = vpop.eup %2665  ;;  %v670_v48 = vadd.f32 1.0, %v2664_v46  ;;  %v3163_v46 = vld [vmem:[#allocation5 + $0x64] ss:$16 sps:$4 sm:$0xff]  }
 0x246   :  { %v676_v49 = vadd.f32 1.0, %v2666_v47  ;;  %v2668_v50 = vpop.eup %2667  ;;  %v3165_v47 = vld [vmem:[#allocation5 + $0x6c] ss:$16 sps:$4 sm:$0xff]  }
 0x247   :  { %2671 = vrcp.f32 %v670_v48  ;;  %v2670_v52 = vpop.eup %2669  ;;  %v683_v57 = vadd.f32 1.0, %v2668_v50  ;;  %v3167_v48 = vld [vmem:[#allocation5 + $0x60] ss:$16 sps:$4 sm:$0xff]   ;;  %v3175_v50 = vld [vmem:[#allocation5 + $0x84] ss:$16 sps:$4 sm:$0xff]  }
 0x248   :  { %2673 = vrcp.f32 %v676_v49  ;;  %v3169_v49 = vld [vmem:[#allocation5 + $0x68] ss:$16 sps:$4 sm:$0xff]  }
 0x249   :  { %2675 = vrcp.f32 %v683_v57  ;;  %v3189_v57 = vld [vmem:[#allocation5 + $0xa0] ss:$16 sps:$4 sm:$0xff]  }
 0x251   :  { %v2672_v53 = vpop.eup %2671 }
 0x252   :  { %v2674_v54 = vpop.eup %2673  ;;  %v687_v55 = vmul.f32 %v2672_v53, %v2670_v52  ;;  %v3177_v52 = vld [vmem:[#allocation5 + $0x8c] ss:$16 sps:$4 sm:$0xff]   ;;  %v3179_v53 = vld [vmem:[#allocation5 + $0x80] ss:$16 sps:$4 sm:$0xff]  }
 0x253   :  { %v686_v58 = vmul.f32 %v2674_v54, %v3048_v56  ;;  %v2676_v60 = vpop.eup %2675  ;;  %v3181_v54 = vld [vmem:[#allocation5 + $0x88] ss:$16 sps:$4 sm:$0xff]  }
 0x255   :  { %v3086_v59 = vadd.f32 %v687_v55, %v686_v58  ;;  %v3185_v55 = vld [vmem:[#allocation5 + $0xa4] ss:$16 sps:$4 sm:$0xff]   ;;  %v3191_v58 = vld [vmem:[#allocation5 + $0xa8] ss:$16 sps:$4 sm:$0xff]  }
 0x257   :  { %2677 = vtanh.f32 %v3086_v59 }
 0x261   :  { %v2678_v51 = vpop.eup %2677 }
 0x262   :  { %v690_v61 = vmul.f32 %v2678_v51, %v2676_v60  ;;  %v3196_v60 = vld [vmem:[#allocation5 + $0xc4] ss:$16 sps:$4 sm:$0xff]   ;;  %v3198_v51 = vld [vmem:[#allocation5 + $0xcc] ss:$16 sps:$4 sm:$0xff]  }
 0x264   :  { %692 = vst [vmem:[#allocation7 + $0x10] sm:$0xff] %v690_v61  ;;  %v698_v62 = vpack.c.bf16 %v690_v61, %v690_v61  ;;  %v3203_v61 = vld [vmem:[#allocation5 + $0xc0] ss:$16 sps:$4 sm:$0xff]  }
 0x266   :  { %924 = vmatmul.mubr.bf16.vlgmr.msra.gmra.mrb[8].mxu0 %v698_v62  ;;  %965 = vmatmul.mubr.bf16.vlgmr.msra.gmra.mrb[8].mxu1 %v698_v62  ;;  %v3205_v62 = vld [vmem:[#allocation5 + $0xc8] ss:$16 sps:$4 sm:$0xff]  }
 0x267   :  { %1202 = vmatpush1.bf16.msra.mxu0 %v2914_v2  ;;  %1243 = vmatpush1.bf16.msra.mxu1 %v2927_v7  ;;  %v694_v2 = vld [vmem:[#allocation2 + $0x60] sm:$0xff] }
 0x268   :  { %1203 = vmatprep.subr.bf16.mxu0 %v2917_v3  ;;  %1244 = vmatprep.subr.bf16.mxu1 %v2937_v10  ;;  %v695_v3 = vld [vmem:[#allocation2 + $0x68] sm:$0xff] }
 0x269   :  { %1233 = vmatprep.mubr.bf16.mxu0 %v2861_v0  ;;  %1274 = vmatprep.mubr.bf16.mxu1 %v2861_v0 }
 0x26b   :  { %1204 = vmatpush1.bf16.msra.mxu0 %v2920_v4  ;;  %1245 = vmatpush1.bf16.msra.mxu1 %v2939_v11 }
 0x26c   :  { %1205 = vmatprep.subr.bf16.mxu0 %v2923_v5  ;;  %1246 = vmatprep.subr.bf16.mxu1 %v2947_v14 }
 0x26f   :  { %1206 = vmatpush1.bf16.msra.mxu0 %v2930_v8  ;;  %1247 = vmatpush1.bf16.msra.mxu1 %v2951_v15 }
 0x270   :  { %1207 = vmatprep.subr.bf16.mxu0 %v2934_v9  ;;  %1248 = vmatprep.subr.bf16.mxu1 %v2954_v16 }
 0x273   :  { %1208 = vmatpush1.bf16.msra.mxu0 %v2943_v12  ;;  %1249 = vmatpush1.bf16.msra.mxu1 %v2963_v19  ;;  %v696_v19 = vld [vmem:[#allocation2 + $0x70] sm:$0xff] }
 0x274   :  { %1209 = vmatprep.subr.bf16.mxu0 %v2945_v13  ;;  %1250 = vmatprep.subr.bf16.mxu1 %v2966_v20 }
 0x277   :  { %1210 = vmatpush1.bf16.msra.mxu0 %v2957_v17  ;;  %1251 = vmatpush1.bf16.msra.mxu1 %v2975_v27  ;;  %v697_v17 = vld [vmem:[#allocation2 + $0x78] sm:$0xff] }
 0x278   :  { %1211 = vmatprep.subr.bf16.mxu0 %v2960_v18  ;;  %1252 = vmatprep.subr.bf16.mxu1 %v2980_v29 }
 0x27b   :  { %1212 = vmatpush1.bf16.msra.mxu0 %v2968_v23  ;;  %1253 = vmatpush1.bf16.msra.mxu1 %v2984_v32 }
 0x27c   :  { %1213 = vmatprep.subr.bf16.mxu0 %v2971_v26  ;;  %1254 = vmatprep.subr.bf16.mxu1 %v2987_v33 }
 0x27f   :  { %1214 = vmatpush1.bf16.msra.mxu0 %v2977_v28  ;;  %1255 = vmatpush1.bf16.msra.mxu1 %v2994_v37 }
 0x280   :  { %1215 = vmatprep.subr.bf16.mxu0 %v2982_v30  ;;  %1256 = vmatprep.subr.bf16.mxu1 %v2997_v38 }
 0x283   :  { %1216 = vmatpush1.bf16.msra.mxu0 %v2991_v34  ;;  %1257 = vmatpush1.bf16.msra.mxu1 %v3002_v40 }
 0x284   :  { %1511 = vmatprep.subr.bf16.mxu0 %v3127_v25  ;;  %1552 = vmatprep.subr.bf16.mxu1 %v3129_v31 }
 0x339   :  { %v925_v4 = vpop.f32.mrb[8].mxu0  ;;  %v966_v5 = vpop.f32.mrb[8].mxu1 }
 0x33a   :  { %v973_v7 = vadd.f32 %v925_v4, %v694_v2  ;;  %v927_v8 = vpop.f32.mrb[9].mxu0  ;;  %v968_v9 = vpop.f32.mrb[9].mxu1  ;;  %v975_v23 = vadd.f32 %v966_v5, %v696_v19  ;;  %v3209_v2 = vld [vmem:[#allocation5 + $0xe4] ss:$16 sps:$4 sm:$0xff]   ;;  %v3215_v4 = vld [vmem:[#allocation5 + $0xe0] ss:$16 sps:$4 sm:$0xff]  }
 0x33b   :  { %v974_v10 = vadd.f32 %v927_v8, %v695_v3  ;;  %v929_v11 = vpop.f32.mrb[10].mxu0  ;;  %v970_v12 = vpop.f32.mrb[10].mxu1  ;;  %v976_v18 = vadd.f32 %v968_v9, %v697_v17  ;;  %v3211_v3 = vld [vmem:[#allocation5 + $0xec] ss:$16 sps:$4 sm:$0xff]   ;;  %v3217_v5 = vld [vmem:[#allocation5 + $0xe8] ss:$16 sps:$4 sm:$0xff]  }
 0x33c   :  { %v2381_v13 = vmul.f32 -1.442695, %v973_v7  ;;  %v930_v14 = vpop.f32.mrb[11].mxu0  ;;  %v971_v15 = vpop.f32.mrb[11].mxu1  ;;  %v1004_v7 = vld [vmem:[#allocation2 + $0x80] sm:$0xff]  ;;  %v1005_v8 = vld [vmem:[#allocation2 + $0x88] sm:$0xff] }
 0x33d   :  { %v2382_v16 = vmul.f32 -1.442695, %v974_v10  ;;  %v2383_v20 = vmul.f32 -1.442695, %v976_v18 }
 0x33e   :  { %2679 = vpow2.f32 %v2381_v13 }
 0x33f   :  { %2681 = vpow2.f32 %v2382_v16 }
 0x340   :  { %2683 = vpow2.f32 %v2383_v20 }
 0x341   :  { %2685 = vtanh.f32 %v975_v23  ;;  %v1007_v23 = vld [vmem:[#allocation2 + $0x98] sm:$0xff] }
 0x348   :  { %v2680_v26 = vpop.eup %2679 }
 0x349   :  { %v2682_v27 = vpop.eup %2681  ;;  %v980_v28 = vadd.f32 1.0, %v2680_v26 }
 0x34a   :  { %v986_v29 = vadd.f32 1.0, %v2682_v27  ;;  %v2684_v30 = vpop.eup %2683  ;;  %v1006_v27 = vld [vmem:[#allocation2 + $0x90] sm:$0xff] }
 0x34b   :  { %2687 = vrcp.f32 %v980_v28  ;;  %v2686_v32 = vpop.eup %2685  ;;  %v993_v38 = vadd.f32 1.0, %v2684_v30 }
 0x34c   :  { %2689 = vrcp.f32 %v986_v29 }
 0x34d   :  { %2691 = vrcp.f32 %v993_v38 }
 0x355   :  { %v2688_v33 = vpop.eup %2687 }
 0x356   :  { %v2690_v34 = vpop.eup %2689  ;;  %v997_v37 = vmul.f32 %v2688_v33, %v2686_v32 }
 0x357   :  { %v996_v40 = vmul.f32 %v2690_v34, %v3086_v59  ;;  %v2692_v63 = vpop.eup %2691  ;;  %v3193_v59 = vld [vmem:[#allocation5 + $0xac] ss:$16 sps:$4 sm:$0xff]  }
 0x359   :  { %v3122_v56 = vadd.f32 %v997_v37, %v996_v40 }
 0x35b   :  { %2693 = vtanh.f32 %v3122_v56 }
 0x365   :  { %v2694_v21 = vpop.eup %2693 }
 0x366   :  { %v1000_v22 = vmul.f32 %v2694_v21, %v2692_v63 }
 0x368   :  { %1002 = vst [vmem:[#allocation7 + $0x18] sm:$0xff] %v1000_v22  ;;  %v1008_v24 = vpack.c.bf16 %v1000_v22, %v1000_v22 }
 0x36a   :  { %1234 = vmatmul.mubr.bf16.vlgmr.msra.gmra.mrb[12].mxu0 %v1008_v24  ;;  %1275 = vmatmul.mubr.bf16.vlgmr.msra.gmra.mrb[12].mxu1 %v1008_v24 }
 0x36b   :  { %1543 = vmatprep.mubr.bf16.mxu0 %v2861_v0  ;;  %1584 = vmatprep.mubr.bf16.mxu1 %v2861_v0 }
 0x36c   :  { %1512 = vmatpush1.bf16.msra.mxu0 %v3131_v35  ;;  %1553 = vmatpush1.bf16.msra.mxu1 %v3133_v36 }
 0x36d   :  { %1513 = vmatprep.subr.bf16.mxu0 %v3139_v39  ;;  %1554 = vmatprep.subr.bf16.mxu1 %v3141_v41 }
 0x370   :  { %1514 = vmatpush1.bf16.msra.mxu0 %v3143_v42  ;;  %1555 = vmatpush1.bf16.msra.mxu1 %v3145_v43 }
 0x371   :  { %1515 = vmatprep.subr.bf16.mxu0 %v3151_v1  ;;  %1556 = vmatprep.subr.bf16.mxu1 %v3153_v44 }
 0x374   :  { %1516 = vmatpush1.bf16.msra.mxu0 %v3155_v6  ;;  %1557 = vmatpush1.bf16.msra.mxu1 %v3157_v45 }
 0x375   :  { %1517 = vmatprep.subr.bf16.mxu0 %v3163_v46  ;;  %1558 = vmatprep.subr.bf16.mxu1 %v3165_v47 }
 0x378   :  { %1518 = vmatpush1.bf16.msra.mxu0 %v3167_v48  ;;  %1559 = vmatpush1.bf16.msra.mxu1 %v3169_v49 }
 0x379   :  { %1519 = vmatprep.subr.bf16.mxu0 %v3175_v50  ;;  %1560 = vmatprep.subr.bf16.mxu1 %v3177_v52 }
 0x37c   :  { %1520 = vmatpush1.bf16.msra.mxu0 %v3179_v53  ;;  %1561 = vmatpush1.bf16.msra.mxu1 %v3181_v54 }
 0x37d   :  { %1521 = vmatprep.subr.bf16.mxu0 %v3185_v55  ;;  %1562 = vmatprep.subr.bf16.mxu1 %v3193_v59 }
 0x380   :  { %1522 = vmatpush1.bf16.msra.mxu0 %v3189_v57  ;;  %1563 = vmatpush1.bf16.msra.mxu1 %v3191_v58 }
 0x381   :  { %1523 = vmatprep.subr.bf16.mxu0 %v3196_v60  ;;  %1564 = vmatprep.subr.bf16.mxu1 %v3198_v51 }
 0x384   :  { %1524 = vmatpush1.bf16.msra.mxu0 %v3203_v61  ;;  %1565 = vmatpush1.bf16.msra.mxu1 %v3205_v62 }
 0x385   :  { %1525 = vmatprep.subr.bf16.mxu0 %v3209_v2  ;;  %1566 = vmatprep.subr.bf16.mxu1 %v3211_v3 }
 0x388   :  { %1526 = vmatpush1.bf16.msra.mxu0 %v3215_v4  ;;  %1567 = vmatpush1.bf16.msra.mxu1 %v3217_v5 }
 0x389   :  { %1821 = vmatprep.subr.bf16.mxu0 %v3127_v25  ;;  %1862 = vmatprep.subr.bf16.mxu1 %v3129_v31 }
 0x43d   :  { %v1235_v9 = vpop.f32.mrb[12].mxu0  ;;  %v1276_v10 = vpop.f32.mrb[12].mxu1 }
 0x43e   :  { %v1283_v11 = vadd.f32 %v1235_v9, %v1004_v7  ;;  %v1237_v12 = vpop.f32.mrb[13].mxu0  ;;  %v1278_v13 = vpop.f32.mrb[13].mxu1  ;;  %v1285_v29 = vadd.f32 %v1276_v10, %v1006_v27 }
 0x43f   :  { %v1284_v14 = vadd.f32 %v1237_v12, %v1005_v8  ;;  %v1239_v15 = vpop.f32.mrb[14].mxu0  ;;  %v1280_v16 = vpop.f32.mrb[14].mxu1  ;;  %v1286_v26 = vadd.f32 %v1278_v13, %v1007_v23  ;;  %v1315_v12 = vld [vmem:[#allocation2 + $0xa8] sm:$0xff] }
 0x440   :  { %v2416_v17 = vmul.f32 -1.442695, %v1283_v11  ;;  %v1240_v18 = vpop.f32.mrb[15].mxu0  ;;  %v1281_v19 = vpop.f32.mrb[15].mxu1 }
 0x441   :  { %v2417_v20 = vmul.f32 -1.442695, %v1284_v14  ;;  %v2418_v28 = vmul.f32 -1.442695, %v1286_v26 }
 0x442   :  { %2695 = vpow2.f32 %v2416_v17 }
 0x443   :  { %2697 = vpow2.f32 %v2417_v20 }
 0x444   :  { %2699 = vpow2.f32 %v2418_v28 }
 0x445   :  { %2701 = vtanh.f32 %v1285_v29  ;;  %v1317_v29 = vld [vmem:[#allocation2 + $0xb8] sm:$0xff] }
 0x44c   :  { %v2696_v30 = vpop.eup %2695 }
 0x44d   :  { %v2698_v32 = vpop.eup %2697  ;;  %v1290_v33 = vadd.f32 1.0, %v2696_v30  ;;  %v1316_v30 = vld [vmem:[#allocation2 + $0xb0] sm:$0xff] }
 0x44e   :  { %v1296_v34 = vadd.f32 1.0, %v2698_v32  ;;  %v2700_v37 = vpop.eup %2699 }
 0x44f   :  { %2703 = vrcp.f32 %v1290_v33  ;;  %v2702_v38 = vpop.eup %2701  ;;  %v1303_v22 = vadd.f32 1.0, %v2700_v37 }
 0x450   :  { %2705 = vrcp.f32 %v1296_v34 }
 0x451   :  { %2707 = vrcp.f32 %v1303_v22 }
 0x459   :  { %v2704_v40 = vpop.eup %2703 }
 0x45a   :  { %v2706_v63 = vpop.eup %2705  ;;  %v1307_v21 = vmul.f32 %v2704_v40, %v2702_v38 }
 0x45b   :  { %v1306_v24 = vmul.f32 %v2706_v63, %v3122_v56  ;;  %v2708_v8 = vpop.eup %2707  ;;  %v1314_v56 = vld [vmem:[#allocation2 + $0xa0] sm:$0xff] }
 0x45d   :  { %v3226_v7 = vadd.f32 %v1307_v21, %v1306_v24 }
 0x45f   :  { %2709 = vtanh.f32 %v3226_v7 }
 0x469   :  { %v2710_v9 = vpop.eup %2709 }
 0x46a   :  { %v1310_v10 = vmul.f32 %v2710_v9, %v2708_v8 }
 0x46c   :  { %1312 = vst [vmem:[#allocation7 + $0x20] sm:$0xff] %v1310_v10  ;;  %v1318_v11 = vpack.c.bf16 %v1310_v10, %v1310_v10 }
 0x46e   :  { %1544 = vmatmul.mubr.bf16.vlgmr.msra.gmra.mrb[16].mxu0 %v1318_v11  ;;  %1585 = vmatmul.mubr.bf16.vlgmr.msra.gmra.mrb[16].mxu1 %v1318_v11 }
 0x46f   :  { %1822 = vmatpush1.bf16.msra.mxu0 %v3131_v35  ;;  %1863 = vmatpush1.bf16.msra.mxu1 %v3133_v36 }
 0x470   :  { %1823 = vmatprep.subr.bf16.mxu0 %v3139_v39  ;;  %1864 = vmatprep.subr.bf16.mxu1 %v3141_v41 }
 0x471   :  { %1853 = vmatprep.mubr.bf16.mxu0 %v2861_v0  ;;  %1894 = vmatprep.mubr.bf16.mxu1 %v2861_v0 }
 0x473   :  { %1824 = vmatpush1.bf16.msra.mxu0 %v3143_v42  ;;  %1865 = vmatpush1.bf16.msra.mxu1 %v3145_v43 }
 0x474   :  { %1825 = vmatprep.subr.bf16.mxu0 %v3151_v1  ;;  %1866 = vmatprep.subr.bf16.mxu1 %v3153_v44 }
 0x477   :  { %1826 = vmatpush1.bf16.msra.mxu0 %v3155_v6  ;;  %1867 = vmatpush1.bf16.msra.mxu1 %v3157_v45 }
 0x478   :  { %1827 = vmatprep.subr.bf16.mxu0 %v3163_v46  ;;  %1868 = vmatprep.subr.bf16.mxu1 %v3165_v47 }
 0x47b   :  { %1828 = vmatpush1.bf16.msra.mxu0 %v3167_v48  ;;  %1869 = vmatpush1.bf16.msra.mxu1 %v3169_v49 }
 0x47c   :  { %1829 = vmatprep.subr.bf16.mxu0 %v3175_v50  ;;  %1870 = vmatprep.subr.bf16.mxu1 %v3177_v52 }
 0x47f   :  { %1830 = vmatpush1.bf16.msra.mxu0 %v3179_v53  ;;  %1871 = vmatpush1.bf16.msra.mxu1 %v3181_v54 }
 0x480   :  { %1831 = vmatprep.subr.bf16.mxu0 %v3185_v55  ;;  %1872 = vmatprep.subr.bf16.mxu1 %v3193_v59 }
 0x483   :  { %1832 = vmatpush1.bf16.msra.mxu0 %v3189_v57  ;;  %1873 = vmatpush1.bf16.msra.mxu1 %v3191_v58 }
 0x484   :  { %1833 = vmatprep.subr.bf16.mxu0 %v3196_v60  ;;  %1874 = vmatprep.subr.bf16.mxu1 %v3198_v51 }
 0x487   :  { %1834 = vmatpush1.bf16.msra.mxu0 %v3203_v61  ;;  %1875 = vmatpush1.bf16.msra.mxu1 %v3205_v62 }
 0x488   :  { %1835 = vmatprep.subr.bf16.mxu0 %v3209_v2  ;;  %1876 = vmatprep.subr.bf16.mxu1 %v3211_v3 }
 0x48b   :  { %1836 = vmatpush1.bf16.msra.mxu0 %v3215_v4  ;;  %1877 = vmatpush1.bf16.msra.mxu1 %v3217_v5 }
 0x48c   :  { %2131 = vmatprep.subr.bf16.mxu0 %v3127_v25  ;;  %2172 = vmatprep.subr.bf16.mxu1 %v3129_v31 }
 0x541   :  { %v1545_v13 = vpop.f32.mrb[16].mxu0  ;;  %v1586_v14 = vpop.f32.mrb[16].mxu1 }
 0x542   :  { %v1593_v15 = vadd.f32 %v1545_v13, %v1314_v56  ;;  %v1547_v16 = vpop.f32.mrb[17].mxu0  ;;  %v1588_v17 = vpop.f32.mrb[17].mxu1  ;;  %v1595_v32 = vadd.f32 %v1586_v14, %v1316_v30 }
 0x543   :  { %v1594_v18 = vadd.f32 %v1547_v16, %v1315_v12  ;;  %v1549_v19 = vpop.f32.mrb[18].mxu0  ;;  %v1590_v20 = vpop.f32.mrb[18].mxu1  ;;  %v1596_v25 = vadd.f32 %v1588_v17, %v1317_v29  ;;  %v1934_v17 = vld [vmem:[#allocation2 + $0xe0] sm:$0xff] }
 0x544   :  { %v2451_v23 = vmul.f32 -1.442695, %v1593_v15  ;;  %v1550_v26 = vpop.f32.mrb[19].mxu0  ;;  %v1591_v27 = vpop.f32.mrb[19].mxu1 }
 0x545   :  { %v2452_v28 = vmul.f32 -1.442695, %v1594_v18  ;;  %v2453_v31 = vmul.f32 -1.442695, %v1596_v25  ;;  %v1935_v18 = vld [vmem:[#allocation2 + $0xe8] sm:$0xff] }
 0x546   :  { %2711 = vpow2.f32 %v2451_v23 }
 0x547   :  { %2713 = vpow2.f32 %v2452_v28 }
 0x548   :  { %2715 = vpow2.f32 %v2453_v31 }
 0x549   :  { %2717 = vtanh.f32 %v1595_v32 }
 0x550   :  { %v2712_v33 = vpop.eup %2711 }
 0x551   :  { %v2714_v34 = vpop.eup %2713  ;;  %v1600_v37 = vadd.f32 1.0, %v2712_v33 }
 0x552   :  { %v1606_v38 = vadd.f32 1.0, %v2714_v34  ;;  %v2716_v40 = vpop.eup %2715  ;;  %v1937_v34 = vld [vmem:[#allocation2 + $0xf8] sm:$0xff] }
 0x553   :  { %2719 = vrcp.f32 %v1600_v37  ;;  %v2718_v63 = vpop.eup %2717  ;;  %v1613_v8 = vadd.f32 1.0, %v2716_v40 }
 0x554   :  { %2721 = vrcp.f32 %v1606_v38  ;;  %v1936_v38 = vld [vmem:[#allocation2 + $0xf0] sm:$0xff] }
 0x555   :  { %2723 = vrcp.f32 %v1613_v8 }
 0x55d   :  { %v2720_v21 = vpop.eup %2719 }
 0x55e   :  { %v2722_v22 = vpop.eup %2721  ;;  %v1617_v24 = vmul.f32 %v2720_v21, %v2718_v63 }
 0x55f   :  { %v1616_v9 = vmul.f32 %v2722_v22, %v3226_v7  ;;  %v2724_v11 = vpop.eup %2723 }
 0x561   :  { %v3264_v10 = vadd.f32 %v1617_v24, %v1616_v9 }
 0x563   :  { %2725 = vtanh.f32 %v3264_v10 }
 0x56d   :  { %v2726_v56 = vpop.eup %2725 }
 0x56e   :  { %v1620_v12 = vmul.f32 %v2726_v56, %v2724_v11 }
 0x570   :  { %1622 = vst [vmem:[#allocation7 + $0x28] sm:$0xff] %v1620_v12  ;;  %v1628_v13 = vpack.c.bf16 %v1620_v12, %v1620_v12 }
 0x572   :  { %1854 = vmatmul.mubr.bf16.vlgmr.msra.gmra.mrb[20].mxu0 %v1628_v13  ;;  %1895 = vmatmul.mubr.bf16.vlgmr.msra.gmra.mrb[20].mxu1 %v1628_v13 }
 0x573   :  { %2132 = vmatpush1.bf16.msra.mxu0 %v3131_v35  ;;  %2173 = vmatpush1.bf16.msra.mxu1 %v3133_v36  ;;  %v1625_v35 = vld [vmem:[#allocation2 + $0xc8] sm:$0xff] }
 0x574   :  { %2133 = vmatprep.subr.bf16.mxu0 %v3139_v39  ;;  %2174 = vmatprep.subr.bf16.mxu1 %v3141_v41 }
 0x575   :  { %2163 = vmatprep.mubr.bf16.mxu0 %v2861_v0  ;;  %2204 = vmatprep.mubr.bf16.mxu1 %v2861_v0  ;;  %v1624_v0 = vld [vmem:[#allocation2 + $0xc0] sm:$0xff] }
 0x577   :  { %2134 = vmatpush1.bf16.msra.mxu0 %v3143_v42  ;;  %2175 = vmatpush1.bf16.msra.mxu1 %v3145_v43 }
 0x578   :  { %2135 = vmatprep.subr.bf16.mxu0 %v3151_v1  ;;  %2176 = vmatprep.subr.bf16.mxu1 %v3153_v44 }
 0x57b   :  { %2136 = vmatpush1.bf16.msra.mxu0 %v3155_v6  ;;  %2177 = vmatpush1.bf16.msra.mxu1 %v3157_v45 }
 0x57c   :  { %2137 = vmatprep.subr.bf16.mxu0 %v3163_v46  ;;  %2178 = vmatprep.subr.bf16.mxu1 %v3165_v47 }
 0x57f   :  { %2138 = vmatpush1.bf16.msra.mxu0 %v3167_v48  ;;  %2179 = vmatpush1.bf16.msra.mxu1 %v3169_v49  ;;  %v1627_v49 = vld [vmem:[#allocation2 + $0xd8] sm:$0xff] }
 0x580   :  { %2139 = vmatprep.subr.bf16.mxu0 %v3175_v50  ;;  %2180 = vmatprep.subr.bf16.mxu1 %v3177_v52  ;;  %v1626_v52 = vld [vmem:[#allocation2 + $0xd0] sm:$0xff] }
 0x583   :  { %2140 = vmatpush1.bf16.msra.mxu0 %v3179_v53  ;;  %2181 = vmatpush1.bf16.msra.mxu1 %v3181_v54 }
 0x584   :  { %2141 = vmatprep.subr.bf16.mxu0 %v3185_v55  ;;  %2182 = vmatprep.subr.bf16.mxu1 %v3193_v59 }
 0x587   :  { %2142 = vmatpush1.bf16.msra.mxu0 %v3189_v57  ;;  %2183 = vmatpush1.bf16.msra.mxu1 %v3191_v58 }
 0x588   :  { %2143 = vmatprep.subr.bf16.mxu0 %v3196_v60  ;;  %2184 = vmatprep.subr.bf16.mxu1 %v3198_v51 }
 0x58b   :  { %2144 = vmatpush1.bf16.msra.mxu0 %v3203_v61  ;;  %2185 = vmatpush1.bf16.msra.mxu1 %v3205_v62 }
 0x58c   :  { %2145 = vmatprep.subr.bf16.mxu0 %v3209_v2  ;;  %2186 = vmatprep.subr.bf16.mxu1 %v3211_v3 }
 0x58f   :  { %2146 = vmatpush1.bf16.msra.mxu0 %v3215_v4  ;;  %2187 = vmatpush1.bf16.msra.mxu1 %v3217_v5 }
 0x645   :  { %v1855_v36 = vpop.f32.mrb[20].mxu0  ;;  %v1896_v39 = vpop.f32.mrb[20].mxu1 }
 0x646   :  { %v1903_v41 = vadd.f32 %v1855_v36, %v1624_v0  ;;  %v1857_v42 = vpop.f32.mrb[21].mxu0  ;;  %v1898_v43 = vpop.f32.mrb[21].mxu1  ;;  %v1905_v54 = vadd.f32 %v1896_v39, %v1626_v52 }
 0x647   :  { %v1904_v1 = vadd.f32 %v1857_v42, %v1625_v35  ;;  %v1859_v44 = vpop.f32.mrb[22].mxu0  ;;  %v1900_v6 = vpop.f32.mrb[22].mxu1  ;;  %v1906_v50 = vadd.f32 %v1898_v43, %v1627_v49 }
 0x648   :  { %v2486_v45 = vmul.f32 -1.442695, %v1903_v41  ;;  %v1860_v46 = vpop.f32.mrb[23].mxu0  ;;  %v1901_v47 = vpop.f32.mrb[23].mxu1 }
 0x649   :  { %v2487_v48 = vmul.f32 -1.442695, %v1904_v1  ;;  %v2488_v53 = vmul.f32 -1.442695, %v1906_v50 }
 0x64a   :  { %2727 = vpow2.f32 %v2486_v45 }
 0x64b   :  { %2729 = vpow2.f32 %v2487_v48 }
 0x64c   :  { %2731 = vpow2.f32 %v2488_v53 }
 0x64d   :  { %2733 = vtanh.f32 %v1905_v54 }
 0x654   :  { %v2728_v55 = vpop.eup %2727 }
 0x655   :  { %v2730_v57 = vpop.eup %2729  ;;  %v1910_v58 = vadd.f32 1.0, %v2728_v55 }
 0x656   :  { %v1916_v59 = vadd.f32 1.0, %v2730_v57  ;;  %v2732_v60 = vpop.eup %2731 }
 0x657   :  { %2735 = vrcp.f32 %v1910_v58  ;;  %v2734_v51 = vpop.eup %2733  ;;  %v1923_v3 = vadd.f32 1.0, %v2732_v60 }
 0x658   :  { %2737 = vrcp.f32 %v1916_v59 }
 0x659   :  { %2739 = vrcp.f32 %v1923_v3 }
 0x661   :  { %v2736_v61 = vpop.eup %2735 }
 0x662   :  { %v2738_v62 = vpop.eup %2737  ;;  %v1927_v2 = vmul.f32 %v2736_v61, %v2734_v51 }
 0x663   :  { %v1926_v4 = vmul.f32 %v2738_v62, %v3264_v10  ;;  %v2740_v7 = vpop.eup %2739 }
 0x665   :  { %v1928_v5 = vadd.f32 %v1927_v2, %v1926_v4 }
 0x667   :  { %2741 = vtanh.f32 %v1928_v5 }
 0x671   :  { %v2742_v14 = vpop.eup %2741 }
 0x672   :  { %v1930_v15 = vmul.f32 %v2742_v14, %v2740_v7 }
 0x674   :  { %1932 = vst [vmem:[#allocation7 + $0x30] sm:$0xff] %v1930_v15  ;;  %v1938_v16 = vpack.c.bf16 %v1930_v15, %v1930_v15 }
 0x676   :  { %2164 = vmatmul.mubr.bf16.vlgmr.msra.gmra.mrb[24].mxu0 %v1938_v16  ;;  %2205 = vmatmul.mubr.bf16.vlgmr.msra.gmra.mrb[24].mxu1 %v1938_v16 }
 0x749   :  { %v2165_v19 = vpop.f32.mrb[24].mxu0  ;;  %v2206_v20 = vpop.f32.mrb[24].mxu1 }
 0x74a   :  { %v2213_v23 = vadd.f32 %v2165_v19, %v1934_v17  ;;  %v2167_v26 = vpop.f32.mrb[25].mxu0  ;;  %v2208_v27 = vpop.f32.mrb[25].mxu1  ;;  %v2215_v63 = vadd.f32 %v2206_v20, %v1936_v38 }
 0x74b   :  { %v2214_v28 = vadd.f32 %v2167_v26, %v1935_v18  ;;  %v2169_v29 = vpop.f32.mrb[26].mxu0  ;;  %v2210_v25 = vpop.f32.mrb[26].mxu1  ;;  %v2216_v37 = vadd.f32 %v2208_v27, %v1937_v34 }
 0x74c   :  { %v2521_v30 = vmul.f32 -1.442695, %v2213_v23  ;;  %v2170_v31 = vpop.f32.mrb[27].mxu0  ;;  %v2211_v32 = vpop.f32.mrb[27].mxu1 }
 0x74d   :  { %v2522_v33 = vmul.f32 -1.442695, %v2214_v28  ;;  %v2523_v40 = vmul.f32 -1.442695, %v2216_v37 }
 0x74e   :  { %2743 = vpow2.f32 %v2521_v30 }
 0x74f   :  { %2745 = vpow2.f32 %v2522_v33 }
 0x750   :  { %2747 = vpow2.f32 %v2523_v40 }
 0x751   :  { %2749 = vtanh.f32 %v2215_v63 }
 0x758   :  { %v2744_v21 = vpop.eup %2743 }
 0x759   :  { %v2746_v22 = vpop.eup %2745  ;;  %v2220_v24 = vadd.f32 1.0, %v2744_v21 }
 0x75a   :  { %v2226_v8 = vadd.f32 1.0, %v2746_v22  ;;  %v2748_v9 = vpop.eup %2747 }
 0x75b   :  { %2751 = vrcp.f32 %v2220_v24  ;;  %v2750_v10 = vpop.eup %2749  ;;  %v2233_v13 = vadd.f32 1.0, %v2748_v9 }
 0x75c   :  { %2753 = vrcp.f32 %v2226_v8 }
 0x75d   :  { %2755 = vrcp.f32 %v2233_v13 }
 0x765   :  { %v2752_v11 = vpop.eup %2751 }
 0x766   :  { %v2754_v56 = vpop.eup %2753  ;;  %v2237_v12 = vmul.f32 %v2752_v11, %v2750_v10 }
 0x767   :  { %v2236_v0 = vmul.f32 %v2754_v56, %v1928_v5 }
 0x769   :  { %v2238_v35 = vadd.f32 %v2237_v12, %v2236_v0 }
 0x76b   :  { %2757 = vtanh.f32 %v2238_v35  ;;  %2243 = vst [vmem:[#allocation8] sm:$0xff] %v2238_v35 }
 0x76c   :  { %2814 = shalt.err (!%p2811_p6)
}
 0x76d   :  { %s2815_s16 = scalar_lea.hbm %s3327_s3, 128 }
 0x76e   :  { %p2816_p7 = scmp.ne.s32.totalorder %s3327_s3, %s2815_s16  ;;  %p2819_p8 = scmp.lt.u32.totalorder %s2815_s16, %s3327_s3 }
 0x770   :  { %p2821_p9 = pnand %p2819_p8, %p2816_p7 }
 0x772   :  { %2824 = shalt.err (!%p2821_p9)
}
 0x773   :  { %2265 = dma.vmem_to_hbm [thread:$0]  %s2263_s12, 128, %s3327_s3, [#allocation9]   ;;  %v2756_v36 = vpop.eup %2755 }
 0x774   :  { %s2863_s23 = smov [#allocation7]  }
 0x775   :  { %s2249_s24 = sshll.u32 %s2863_s23, 4  ;;  %v2758_v39 = vpop.eup %2757  ;;  %s2250_s24 = int_to_ptr.vmem [resolvable:$true] %s2249_s24 }
 0x776   :  { %v2240_v41 = vmul.f32 %v2758_v39, %v2756_v36  ;;  %s2825_s25 = scalar_lea.vmem %s2250_s24, 1024  ;;  %p2830_p11 = scmp.lt.s32.totalorder %s2250_s24, %s2250_s24 }
 0x777   :  { %p2826_p10 = scmp.ne.s32.totalorder %s2250_s24, %s2825_s25  ;;  %p2831_p12 = scmp.lt.s32.totalorder %s2825_s25, %s2825_s25 }
 0x778   :  { %2242 = vst [vmem:[#allocation7 + $0x38] sm:$0xff] %v2240_v41 }
 0x779   :  { %p2832_p13 = por %p2831_p12, %p2830_p11 }
 0x77b   :  { %p2833_p0 = pnand %p2832_p13, %p2826_p10 }
 0x77d   :  { %2836 = shalt.err (!%p2833_p0)
}
 0x77e   :  { %s2837_s28 = scalar_lea.hbm %s3326_s2, 1024 }
 0x77f   :  { %p2838_p1 = scmp.ne.s32.totalorder %s3326_s2, %s2837_s28  ;;  %p2841_p2 = scmp.lt.u32.totalorder %s2837_s28, %s3326_s2 }
 0x781   :  { %p2843_p3 = pnand %p2841_p2, %p2838_p1 }
 0x783   :  { %2846 = shalt.err (!%p2843_p3)
}
 0x784   :  { %s2864_s5 = smov 128   ;;  %s2865_s6 = smov 8  }
 0x785   :  { %2255 = dma.vmem_to_hbm [thread:$0]  %s2250_s24, 1024, %s3326_s2, [#allocation4], %s2864_s5, %s2864_s5, %s2865_s6  }
 0x786   :  { %2851 = dma.done.wait [#allocation4], 1024  }
 0x787   :  { %2852 = vsyncadd [#allocation4], 4294966272 }
 0x788   :  { %2853 = dma.done.wait [#allocation9], 128  }
 0x789   :  { %2854 = vsyncadd [#allocation9], 4294967168 }
 0x78a   :  { %2272 = vsyncpa [#allocation3], 1 }
 0x78b   :  { %2273 = vsyncpa [#allocation6], 1 }
 0x78c   :  { %2274 = vsyncpa [#allocation4], 1 }
 0x78d   :  { %2275 = vsyncpa [#allocation9], 1 }

</bundles_post_ra>
